<compile_context>
chip_gen: v5e
topology: v5e:2x2
jax: 0.10.0
libtpu: 0.0.40
codegen_flags: <defaults>
</compile_context>

<pallas_src>
import numpy as np
import jax
import jax.numpy as jnp
from jax.experimental import pallas as pl
from jax.experimental.pallas import tpu as pltpu

# Small, deterministic model config: NeuralModel(nfeatures=32, ndrugs=4,
# ndoses=8, layers=[64, 32], dropout=True, batchnorm=True) in eval mode.
NFEATURES = 32
NDRUGS = 4
NDOSES = 8
NOUT = NDRUGS * NDOSES            # 32
LAYERS = (64, 32)
BN_EPS = 1e-5

# Lane packing: PACK batch rows share one lane-row, block-diagonal weights.
# PACK * NFEATURES = PACK * NOUT = 256, hidden dims become 512 / 256.
PACK = 8
ROW_ALIGN = 16                    # bf16 sublane tile along the packed-row axis
DEFAULT_PACKED_TILE = 512         # packed rows per grid step (= 4096 batch rows)

BATCHES = (32, 300)               # demo batch sizes for the self-check


def _round_up(v, m):
    return ((v + m - 1) // m) * m


# ----------------------------------------------------------------------------
# Constant head matrices (compile-time numpy, never built on the VPU).
# mu = fwd @ A + softplus(fwd) @ B, where per drug block of NDOSES columns:
#   mu[:, d*D + 0] = fwd[:, d*D + 0]
#   mu[:, d*D + j] = fwd[:, d*D + 0] + sum_{k=1..j} softplus(fwd[:, d*D + k])
# ----------------------------------------------------------------------------
def _head_matrices():
    r = np.arange(NOUT)[:, None]
    c = np.arange(NOUT)[None, :]
    same = (r // NDOSES) == (c // NDOSES)
    a_mat = (same & ((r % NDOSES) == 0)).astype(np.float32)
    b_mat = (same & ((r % NDOSES) >= 1)
             & ((c % NDOSES) >= (r % NDOSES))).astype(np.float32)
    return a_mat, b_mat


# ----------------------------------------------------------------------------
# Kernel: shapes are the PACK-packed ones (lane dims all multiples of 128).
# ----------------------------------------------------------------------------
def neural_model_kernel(x_ref,
                        w1_ref, b1_ref,
                        w2_ref, b2_ref,
                        wo_ref, bo_ref,
                        a_ref, b_ref,
                        tau_ref):
    x = x_ref[...]                                            # bf16 (bt, 256)

    # hidden layers (eval-mode BN already folded into W/b in the wrapper);
    # bf16 MXU operands, f32 accumulation, f32 bias/ReLU.
    h = jnp.dot(x, w1_ref[...], preferred_element_type=jnp.float32) + b1_ref[...]
    h = jnp.maximum(h, 0.0).astype(jnp.bfloat16)
    h = jnp.dot(h, w2_ref[...], preferred_element_type=jnp.float32) + b2_ref[...]
    h = jnp.maximum(h, 0.0).astype(jnp.bfloat16)

    # final linear -> fwd is (bt, PACK*NOUT) in f32
    fwd = jnp.dot(h, wo_ref[...], preferred_element_type=jnp.float32) + bo_ref[...]

    # numerically stable softplus (beta=1), matches torch.nn.Softplus
    sp = jnp.maximum(fwd, 0.0) + jnp.log1p(jnp.exp(-jnp.abs(fwd)))

    # monotone per-drug head: two MXU matmuls against constant 0/1 matrices
    # (exact in bf16); no lane-axis concat/relayout.
    mu = (jnp.dot(fwd.astype(jnp.bfloat16), a_ref[...],
                  preferred_element_type=jnp.float32)
          + jnp.dot(sp.astype(jnp.bfloat16), b_ref[...],
                    preferred_element_type=jnp.float32))

    # exact sigmoid with a single EUP push: sigmoid(x) = 0.5*tanh(0.5*x)+0.5
    tau_ref[...] = 0.5 * jnp.tanh(0.5 * mu) + 0.5


# ----------------------------------------------------------------------------
# Parameter preparation (host side, once per call — jit/pre-pack in prod).
# ----------------------------------------------------------------------------
def _fold_batchnorm(params):
    """Fold eval-mode BN (scale, shift) into the following Linear."""
    s1, t1, w1, b1, s2, t2, w2, b2, wo, bo = params
    w1f = s1.reshape(-1, 1) * w1          # diag(s1) @ W1
    b1f = t1 @ w1 + b1
    w2f = s2.reshape(-1, 1) * w2
    b2f = t2 @ w2 + b2
    return w1f, b1f, w2f, b2f, wo, bo


def _block_diag(w, pack):
    return jnp.kron(jnp.eye(pack, dtype=w.dtype), w)


def _prepare_packed_params(params):
    w1f, b1f, w2f, b2f, wo, bo = _fold_batchnorm(params)
    a_np, b_np = _head_matrices()

    def pack_w(w):                         # bf16 MXU operand, block-diagonal
        return _block_diag(w, PACK).astype(jnp.bfloat16)

    def tile_b(b):                         # f32 bias, repeated per lane block
        return jnp.tile(b, (1, PACK)).astype(jnp.float32)

    return (pack_w(w1f), tile_b(b1f),
            pack_w(w2f), tile_b(b2f),
            pack_w(wo), tile_b(bo),
            pack_w(jnp.asarray(a_np)), pack_w(jnp.asarray(b_np)))


def _choose_row_tile(rows, packed_tile):
    # Tiny inputs: one full-array step.
    if rows <= 2 * ROW_ALIGN:
        return rows
    # Otherwise guarantee >= 2 grid steps (v7x has 2 TensorCores to shard the
    # "parallel" axis across), capped by the requested tile so large batches
    # stay well inside every generation's scoped-VMEM default.
    half = (rows + 1) // 2
    bt = min(packed_tile, half)
    return max(ROW_ALIGN, _round_up(bt, ROW_ALIGN))


# ----------------------------------------------------------------------------
# Wrapper
# ----------------------------------------------------------------------------
def neural_model_forward(x, params, *, packed_tile=DEFAULT_PACKED_TILE):
    n = x.shape[0]
    # Pad the batch to a multiple of PACK*ROW_ALIGN so the packed layout is
    # (rows, PACK*NFEATURES) with rows % 16 == 0 (bf16 sublane tile).  Padded
    # rows are zeros; the block-diagonal weights keep each packed sub-row
    # independent, so padding never contaminates real rows and is sliced off.
    n_pad = _round_up(max(n, 1), PACK * ROW_ALIGN)
    if n_pad != n:
        x = jnp.pad(x, ((0, n_pad - n), (0, 0)))
    rows = n_pad // PACK
    xp = x.reshape(rows, PACK * NFEATURES).astype(jnp.bfloat16)

    bt = _choose_row_tile(rows, packed_tile)
    grid = (pl.cdiv(rows, bt),)

    w1, b1, w2, b2, wo, bo, a_m, b_m = _prepare_packed_params(params)

    def bcast(shape):
        # full-array constant block, reused by every batch tile
        return pl.BlockSpec(shape, lambda i: (0,) * len(shape))

    in_specs = [
        pl.BlockSpec((bt, PACK * NFEATURES), lambda i: (i, 0)),   # packed x
        bcast(w1.shape), bcast(b1.shape),                         # W1', b1'
        bcast(w2.shape), bcast(b2.shape),                         # W2', b2'
        bcast(wo.shape), bcast(bo.shape),                         # Wo,  bo
        bcast(a_m.shape), bcast(b_m.shape),                       # head A, B
    ]

    # VMEM per step (bt=512): x 256 KiB + out 512 KiB (x2 double-buffered)
    # + ~0.9 MiB of constant bf16 weights (x2)  ->  ~3.5 MiB, far under the
    # 16 MiB (v5e) / 32 MiB (v6e, v7x) scoped defaults.
    out = pl.pallas_call(
        neural_model_kernel,
        out_shape=jax.ShapeDtypeStruct((rows, PACK * NOUT), jnp.float32),
        grid=grid,
        in_specs=in_specs,
        out_specs=pl.BlockSpec((bt, PACK * NOUT), lambda i: (i, 0)),
        compiler_params=pltpu.CompilerParams(dimension_semantics=("parallel",)),
    )(xp, w1, b1, w2, b2, wo, bo, a_m, b_m)

    return out.reshape(n_pad, NOUT)[:n].reshape(n, NDRUGS, NDOSES)


# ----------------------------------------------------------------------------
# Parameter init (deterministic) and references
# ----------------------------------------------------------------------------
def init_params(key):
    ks = jax.random.split(key, 14)

    def linear(kw, kb, fan_in, fan_out):
        lim = 1.0 / np.sqrt(fan_in)
        w = jax.random.uniform(kw, (fan_in, fan_out), jnp.float32, -lim, lim)
        b = jax.random.uniform(kb, (1, fan_out), jnp.float32, -lim, lim)
        return w, b

    def batchnorm(kg, kb, km, kv, dim):
        gamma = 1.0 + 0.1 * jax.random.normal(kg, (1, dim), jnp.float32)
        beta = 0.1 * jax.random.normal(kb, (1, dim), jnp.float32)
        mean = 0.1 * jax.random.normal(km, (1, dim), jnp.float32)
        var = jnp.abs(1.0 + 0.1 * jax.random.normal(kv, (1, dim), jnp.float32))
        scale = gamma / jnp.sqrt(var + BN_EPS)   # eval-mode BN as scale/shift
        shift = beta - mean * scale
        return scale, shift

    s1, t1 = batchnorm(ks[0], ks[1], ks[2], ks[3], NFEATURES)
    w1, b1 = linear(ks[4], ks[5], NFEATURES, LAYERS[0])
    s2, t2 = batchnorm(ks[6], ks[7], ks[8], ks[9], LAYERS[0])
    w2, b2 = linear(ks[10], ks[11], LAYERS[0], LAYERS[1])
    wo, bo = linear(ks[12], ks[13], LAYERS[1], NOUT)
    return (s1, t1, w1, b1, s2, t2, w2, b2, wo, bo)


def reference_forward_f32(x, params):
    """Pure-f32 JAX restatement of the PyTorch forward (eval mode)."""
    s1, t1, w1, b1, s2, t2, w2, b2, wo, bo = params
    h = jnp.maximum((x * s1 + t1) @ w1 + b1, 0.0)
    h = jnp.maximum((h * s2 + t2) @ w2 + b2, 0.0)
    fwd = (h @ wo + bo).reshape(-1, NDRUGS, NDOSES)
    sp = jax.nn.softplus(fwd[:, :, 1:])
    mu = jnp.concatenate(
        [fwd[:, :, 0:1], fwd[:, :, 0:1] + jnp.cumsum(sp, axis=2)], axis=2)
    return jax.nn.sigmoid(mu)


def reference_forward_matched(x, params):
    """Same math with the kernel's precision choices (bf16 MXU operands, f32
    accumulation / bias / softplus, exact sigmoid).  The block-diagonal lane
    packing is mathematically exact, so it is not modelled here."""
    w1f, b1f, w2f, b2f, wo, bo = _fold_batchnorm(params)
    a_np, b_np = _head_matrices()
    bf = lambda v: v.astype(jnp.bfloat16)
    h = jnp.dot(bf(x), bf(w1f), preferred_element_type=jnp.float32) + b1f
    h = bf(jnp.maximum(h, 0.0))
    h = jnp.dot(h, bf(w2f), preferred_element_type=jnp.float32) + b2f
    h = bf(jnp.maximum(h, 0.0))
    fwd = jnp.dot(h, bf(wo), preferred_element_type=jnp.float32) + bo
    sp = jnp.maximum(fwd, 0.0) + jnp.log1p(jnp.exp(-jnp.abs(fwd)))
    mu = (jnp.dot(bf(fwd), bf(jnp.asarray(a_np)),
                  preferred_element_type=jnp.float32)
          + jnp.dot(bf(sp), bf(jnp.asarray(b_np)),
                    preferred_element_type=jnp.float32))
    return jax.nn.sigmoid(mu).reshape(-1, NDRUGS, NDOSES)


if __name__ == "__main__":
    key = jax.random.PRNGKey(0)
    k_params, k_x = jax.random.split(key)
    params = init_params(k_params)

    for idx, batch in enumerate(BATCHES):
        kx = jax.random.fold_in(k_x, idx)
        x = jax.random.normal(kx, (batch, NFEATURES), jnp.float32)

        ref_matched = np.asarray(reference_forward_matched(x, params))
        ref_f32 = np.asarray(reference_forward_f32(x, params))

        # Default (large tile) and a small tile to exercise the multi-step
        # parallel grid + partial-last-block path.
        for tile in (DEFAULT_PACKED_TILE, 16):
            tau = jax.block_until_ready(
                neural_model_forward(x, params, packed_tile=tile))
            assert tau.shape == (batch, NDRUGS, NDOSES)
            tau_np = np.asarray(tau)
            # Tight check against the precision-matched reference (only
            # accumulation-order differences remain).
            np.testing.assert_allclose(tau_np, ref_matched, rtol=2e-3, atol=2e-3)
            # Sanity check against the full-f32 ground truth; the gap is the
            # deliberate bf16 MXU-operand cast.
            np.testing.assert_allclose(tau_np, ref_f32, rtol=3e-2, atol=3e-2)

    print("KERNEL_OK")
</pallas_src>

<mosaic_0001>
module attributes {stable_mosaic.version = 11 : i64} {
  func.func @neural_model_kernel(%arg0: i32, %arg1: memref<16x256xbf16, #tpu.memory_space<vmem>>, %arg2: memref<256x512xbf16, #tpu.memory_space<vmem>>, %arg3: memref<1x512xf32, #tpu.memory_space<vmem>>, %arg4: memref<512x256xbf16, #tpu.memory_space<vmem>>, %arg5: memref<1x256xf32, #tpu.memory_space<vmem>>, %arg6: memref<256x256xbf16, #tpu.memory_space<vmem>>, %arg7: memref<1x256xf32, #tpu.memory_space<vmem>>, %arg8: memref<256x256xbf16, #tpu.memory_space<vmem>>, %arg9: memref<256x256xbf16, #tpu.memory_space<vmem>>, %arg10: memref<16x256xf32, #tpu.memory_space<vmem>>) attributes {dimension_semantics = [#tpu.dimension_semantics<parallel>], iteration_bounds = array<i64: 1>, scalar_prefetch = 0 : i64, scratch_operands = 0 : i64, tpu.core_type = #tpu.core_type<tc>, window_params = [{transform_indices = @transform_0, window_bounds = array<i64: 16, 256>}, {pipeline_mode = #tpu.pipeline_mode<synchronous>, transform_indices = @transform_1, window_bounds = array<i64: 256, 512>}, {pipeline_mode = #tpu.pipeline_mode<synchronous>, transform_indices = @transform_2, window_bounds = array<i64: 1, 512>}, {pipeline_mode = #tpu.pipeline_mode<synchronous>, transform_indices = @transform_3, window_bounds = array<i64: 512, 256>}, {pipeline_mode = #tpu.pipeline_mode<synchronous>, transform_indices = @transform_4, window_bounds = array<i64: 1, 256>}, {pipeline_mode = #tpu.pipeline_mode<synchronous>, transform_indices = @transform_5, window_bounds = array<i64: 256, 256>}, {pipeline_mode = #tpu.pipeline_mode<synchronous>, transform_indices = @transform_6, window_bounds = array<i64: 1, 256>}, {pipeline_mode = #tpu.pipeline_mode<synchronous>, transform_indices = @transform_7, window_bounds = array<i64: 256, 256>}, {pipeline_mode = #tpu.pipeline_mode<synchronous>, transform_indices = @transform_8, window_bounds = array<i64: 256, 256>}, {transform_indices = @transform_9, window_bounds = array<i64: 16, 256>}]} {
    %c0 = arith.constant 0 : index
    %c0_0 = arith.constant 0 : index
    %0 = vector.load %arg1[%c0, %c0_0] : memref<16x256xbf16, #tpu.memory_space<vmem>>, vector<16x256xbf16>
    %c0_1 = arith.constant 0 : index
    %c0_2 = arith.constant 0 : index
    %1 = vector.load %arg2[%c0_1, %c0_2] : memref<256x512xbf16, #tpu.memory_space<vmem>>, vector<256x512xbf16>
    %cst = arith.constant dense<0.000000e+00> : vector<16x512xf32>
    %2 = tpu.matmul %0, %1, %cst {dimension_numbers = #tpu.dot_dimension_numbers<[1], [0], [0], [1], [0, 0, 1, 1], [], []>} : vector<16x256xbf16>, vector<256x512xbf16>, vector<16x512xf32> -> vector<16x512xf32>
    %c0_3 = arith.constant 0 : index
    %c0_4 = arith.constant 0 : index
    %3 = vector.load %arg3[%c0_3, %c0_4] : memref<1x512xf32, #tpu.memory_space<vmem>>, vector<1x512xf32>
    %4 = vector.broadcast %3 : vector<1x512xf32> to vector<16x512xf32>
    %5 = arith.addf %2, %4 : vector<16x512xf32>
    %cst_5 = arith.constant 0.000000e+00 : f32
    %6 = vector.broadcast %cst_5 : f32 to vector<16x512xf32>
    %7 = arith.maximumf %5, %6 : vector<16x512xf32>
    %8 = arith.truncf %7 : vector<16x512xf32> to vector<16x512xbf16>
    %c0_6 = arith.constant 0 : index
    %c0_7 = arith.constant 0 : index
    %9 = vector.load %arg4[%c0_6, %c0_7] : memref<512x256xbf16, #tpu.memory_space<vmem>>, vector<512x256xbf16>
    %cst_8 = arith.constant dense<0.000000e+00> : vector<16x256xf32>
    %10 = tpu.matmul %8, %9, %cst_8 {dimension_numbers = #tpu.dot_dimension_numbers<[1], [0], [0], [1], [0, 0, 1, 1], [], []>} : vector<16x512xbf16>, vector<512x256xbf16>, vector<16x256xf32> -> vector<16x256xf32>
    %c0_9 = arith.constant 0 : index
    %c0_10 = arith.constant 0 : index
    %11 = vector.load %arg5[%c0_9, %c0_10] : memref<1x256xf32, #tpu.memory_space<vmem>>, vector<1x256xf32>
    %12 = vector.broadcast %11 : vector<1x256xf32> to vector<16x256xf32>
    %13 = arith.addf %10, %12 : vector<16x256xf32>
    %cst_11 = arith.constant 0.000000e+00 : f32
    %14 = vector.broadcast %cst_11 : f32 to vector<16x256xf32>
    %15 = arith.maximumf %13, %14 : vector<16x256xf32>
    %16 = arith.truncf %15 : vector<16x256xf32> to vector<16x256xbf16>
    %c0_12 = arith.constant 0 : index
    %c0_13 = arith.constant 0 : index
    %17 = vector.load %arg6[%c0_12, %c0_13] : memref<256x256xbf16, #tpu.memory_space<vmem>>, vector<256x256xbf16>
    %cst_14 = arith.constant dense<0.000000e+00> : vector<16x256xf32>
    %18 = tpu.matmul %16, %17, %cst_14 {dimension_numbers = #tpu.dot_dimension_numbers<[1], [0], [0], [1], [0, 0, 1, 1], [], []>} : vector<16x256xbf16>, vector<256x256xbf16>, vector<16x256xf32> -> vector<16x256xf32>
    %c0_15 = arith.constant 0 : index
    %c0_16 = arith.constant 0 : index
    %19 = vector.load %arg7[%c0_15, %c0_16] : memref<1x256xf32, #tpu.memory_space<vmem>>, vector<1x256xf32>
    %20 = vector.broadcast %19 : vector<1x256xf32> to vector<16x256xf32>
    %21 = arith.addf %18, %20 : vector<16x256xf32>
    %cst_17 = arith.constant 0.000000e+00 : f32
    %22 = vector.broadcast %cst_17 : f32 to vector<16x256xf32>
    %23 = arith.maximumf %21, %22 : vector<16x256xf32>
    %24 = math.absf %21 : vector<16x256xf32>
    %cst_18 = arith.constant 0.000000e+00 : f32
    %25 = vector.broadcast %cst_18 : f32 to vector<16x256xf32>
    %26 = arith.subf %25, %24 : vector<16x256xf32>
    %27 = math.exp %26 : vector<16x256xf32>
    %28 = math.log1p %27 : vector<16x256xf32>
    %29 = arith.addf %23, %28 : vector<16x256xf32>
    %30 = arith.truncf %21 : vector<16x256xf32> to vector<16x256xbf16>
    %c0_19 = arith.constant 0 : index
    %c0_20 = arith.constant 0 : index
    %31 = vector.load %arg8[%c0_19, %c0_20] : memref<256x256xbf16, #tpu.memory_space<vmem>>, vector<256x256xbf16>
    %cst_21 = arith.constant dense<0.000000e+00> : vector<16x256xf32>
    %32 = tpu.matmul %30, %31, %cst_21 {dimension_numbers = #tpu.dot_dimension_numbers<[1], [0], [0], [1], [0, 0, 1, 1], [], []>} : vector<16x256xbf16>, vector<256x256xbf16>, vector<16x256xf32> -> vector<16x256xf32>
    %33 = arith.truncf %29 : vector<16x256xf32> to vector<16x256xbf16>
    %c0_22 = arith.constant 0 : index
    %c0_23 = arith.constant 0 : index
    %34 = vector.load %arg9[%c0_22, %c0_23] : memref<256x256xbf16, #tpu.memory_space<vmem>>, vector<256x256xbf16>
    %cst_24 = arith.constant dense<0.000000e+00> : vector<16x256xf32>
    %35 = tpu.matmul %33, %34, %cst_24 {dimension_numbers = #tpu.dot_dimension_numbers<[1], [0], [0], [1], [0, 0, 1, 1], [], []>} : vector<16x256xbf16>, vector<256x256xbf16>, vector<16x256xf32> -> vector<16x256xf32>
    %36 = arith.addf %32, %35 : vector<16x256xf32>
    %cst_25 = arith.constant 5.000000e-01 : f32
    %37 = vector.broadcast %cst_25 : f32 to vector<16x256xf32>
    %38 = arith.mulf %37, %36 : vector<16x256xf32>
    %39 = math.tanh %38 : vector<16x256xf32>
    %cst_26 = arith.constant 5.000000e-01 : f32
    %40 = vector.broadcast %cst_26 : f32 to vector<16x256xf32>
    %41 = arith.mulf %40, %39 : vector<16x256xf32>
    %cst_27 = arith.constant 5.000000e-01 : f32
    %42 = vector.broadcast %cst_27 : f32 to vector<16x256xf32>
    %43 = arith.addf %41, %42 : vector<16x256xf32>
    %c0_28 = arith.constant 0 : index
    %c0_29 = arith.constant 0 : index
    %44 = vector.load %arg10[%c0_28, %c0_29] : memref<16x256xf32, #tpu.memory_space<vmem>>, vector<16x256xf32>
    tpu.vector_store %arg10[%c0_28, %c0_29], %43 {strides = array<i32>} : memref<16x256xf32, #tpu.memory_space<vmem>>, vector<16x256xf32>,
    return
  }
  func.func @transform_0(%arg0: i32) -> (i32, i32) {
    %c0_i32 = arith.constant 0 : i32
    %c0_i32_0 = arith.constant 0 : i32
    return %arg0, %c0_i32 : i32, i32
  }
  func.func @transform_1(%arg0: i32) -> (i32, i32) {
    %c0_i32 = arith.constant 0 : i32
    %c0_i32_0 = arith.constant 0 : i32
    %c0_i32_1 = arith.constant 0 : i32
    return %c0_i32, %c0_i32_0 : i32, i32
  }
  func.func @transform_2(%arg0: i32) -> (i32, i32) {
    %c0_i32 = arith.constant 0 : i32
    %c0_i32_0 = arith.constant 0 : i32
    %c0_i32_1 = arith.constant 0 : i32
    return %c0_i32, %c0_i32_0 : i32, i32
  }
  func.func @transform_3(%arg0: i32) -> (i32, i32) {
    %c0_i32 = arith.constant 0 : i32
    %c0_i32_0 = arith.constant 0 : i32
    %c0_i32_1 = arith.constant 0 : i32
    return %c0_i32, %c0_i32_0 : i32, i32
  }
  func.func @transform_4(%arg0: i32) -> (i32, i32) {
    %c0_i32 = arith.constant 0 : i32
    %c0_i32_0 = arith.constant 0 : i32
    %c0_i32_1 = arith.constant 0 : i32
    return %c0_i32, %c0_i32_0 : i32, i32
  }
  func.func @transform_5(%arg0: i32) -> (i32, i32) {
    %c0_i32 = arith.constant 0 : i32
    %c0_i32_0 = arith.constant 0 : i32
    %c0_i32_1 = arith.constant 0 : i32
    return %c0_i32, %c0_i32_0 : i32, i32
  }
  func.func @transform_6(%arg0: i32) -> (i32, i32) {
    %c0_i32 = arith.constant 0 : i32
    %c0_i32_0 = arith.constant 0 : i32
    %c0_i32_1 = arith.constant 0 : i32
    return %c0_i32, %c0_i32_0 : i32, i32
  }
  func.func @transform_7(%arg0: i32) -> (i32, i32) {
    %c0_i32 = arith.constant 0 : i32
    %c0_i32_0 = arith.constant 0 : i32
    %c0_i32_1 = arith.constant 0 : i32
    return %c0_i32, %c0_i32_0 : i32, i32
  }
  func.func @transform_8(%arg0: i32) -> (i32, i32) {
    %c0_i32 = arith.constant 0 : i32
    %c0_i32_0 = arith.constant 0 : i32
    %c0_i32_1 = arith.constant 0 : i32
    return %c0_i32, %c0_i32_0 : i32, i32
  }
  func.func @transform_9(%arg0: i32) -> (i32, i32) {
    %c0_i32 = arith.constant 0 : i32
    %c0_i32_0 = arith.constant 0 : i32
    return %arg0, %c0_i32 : i32, i32
  }
}

</mosaic_0001>

<bundles_post_ra>
// kernel: tpu_custom_call.1
= control target key start
LH: loop header
LB: loop body
LE: loop exit
PB: predicated region body
PF: predicated region fallthrough
CT: control target
= control target key end

     0   :  { %14 = vsyncpa [#allocation3], 0  ;;  %s3577_s0 = inlined_call_operand.hbm [shape: bf16[16,256], index: 0, kind: input, shape index: {}]   ;;  %s3578_s1 = inlined_call_operand.hbm [shape: bf16[256,512], index: 1, kind: input, shape index: {}]   ;;  %s3579_s2 = inlined_call_operand.hbm [shape: f32[1,512], index: 2, kind: input, shape index: {}]   ;;  %s3580_s3 = inlined_call_operand.hbm [shape: bf16[512,256], index: 3, kind: input, shape index: {}]   ;;  %s3581_s4 = inlined_call_operand.vmem [shape: f32[1,256], index: 4, kind: input, shape index: {}]   ;;  %s3582_s5 = inlined_call_operand.hbm [shape: bf16[256,256], index: 5, kind: input, shape index: {}]   ;;  %s3583_s6 = inlined_call_operand.vmem [shape: f32[1,256], index: 6, kind: input, shape index: {}]   ;;  %s3584_s7 = inlined_call_operand.hbm [shape: bf16[256,256], index: 7, kind: input, shape index: {}]   ;;  %s3585_s8 = inlined_call_operand.hbm [shape: bf16[256,256], index: 8, kind: input, shape index: {}]   ;;  %s3586_s9 = inlined_call_operand.hbm [shape: f32[16,256], index: 9, kind: output, shape index: {}]  }
   0x1   :  { %15 = vsyncpa [#allocation6], 0 }
   0x2   :  { %16 = vsyncpa [#allocation9], 0 }
   0x3   :  { %17 = vsyncpa [#allocation12], 0  ;;  %s36_s11 = sshll.u32 %s3578_s1, 4  ;;  %s37_s11 = int_to_ptr.hbm [resolvable:$true] %s36_s11 }
   0x4   :  { %18 = vsyncpa [#allocation4], 0  ;;  %s3402_s12 = smov [#allocation5]   ;;  %s3403_s14 = smov 256  }
   0x5   :  { %s38_s13 = sshll.u32 %s3402_s12, 4  ;;  %s3404_s15 = smov 16   ;;  %s39_s13 = int_to_ptr.vmem [resolvable:$true] %s38_s13 }
   0x6   :  { %44 = dma.hbm_to_vmem [thread:$0]  %s37_s11, 8192, %s39_s13, [#allocation6], %s3403_s14, %s3403_s14, %s3404_s15  }
   0x7   :  { %s60_s18 = sshll.u32 %s3580_s3, 4  ;;  %s3405_s19 = smov [#allocation8]   ;;  %s61_s18 = int_to_ptr.hbm [resolvable:$true] %s60_s18 }
   0x8   :  { %s62_s20 = sshll.u32 %s3405_s19, 4  ;;  %s90_s22 = sshll.u32 %s3584_s7, 4  ;;  %s63_s20 = int_to_ptr.vmem [resolvable:$true] %s62_s20  ;;  %s91_s22 = int_to_ptr.hbm [resolvable:$true] %s90_s22 }
   0x9   :  { %s3406_s23 = smov 128   ;;  %s3407_s24 = smov 8  }
   0xa   :  { %68 = dma.hbm_to_vmem [thread:$0]  %s61_s18, 8192, %s63_s20, [#allocation9], %s3406_s23, %s3406_s23, %s3407_s24  }
   0xb   :  { %s23_s27 = sshll.u32 %s3577_s0, 4  ;;  %s3408_s3 = smov [#allocation11]   ;;  %s24_s27 = int_to_ptr.hbm [resolvable:$true] %s23_s27 }
   0xc   :  { %s92_s28 = sshll.u32 %s3408_s3, 4  ;;  %s3409_s7 = smov [#allocation2]   ;;  %s93_s28 = int_to_ptr.vmem [resolvable:$true] %s92_s28 }
   0xd   :  { %98 = dma.hbm_to_vmem [thread:$0]  %s91_s22, 4096, %s93_s28, [#allocation12], %s3406_s23, %s3406_s23, %s3407_s24  }
   0xe   :  { %s25_s29 = sshll.u32 %s3409_s7, 4  ;;  %s50_s11 = sshll.u32 %s3579_s2, 4  ;;  %s26_s29 = int_to_ptr.vmem [resolvable:$true] %s25_s29  ;;  %s51_s11 = int_to_ptr.hbm [resolvable:$true] %s50_s11 }
   0xf   :  { %31 = dma.hbm_to_vmem [thread:$0]  %s24_s27, 256, %s26_s29, [#allocation3], %s3406_s23, %s3406_s23, %s3407_s24  }
  0x10   :  { %s75_s13 = sshll.u32 %s3582_s5, 4  ;;  %s3410_s16 = smov [#allocation7]   ;;  %s76_s13 = int_to_ptr.hbm [resolvable:$true] %s75_s13 }
  0x11   :  { %s52_s17 = sshll.u32 %s3410_s16, 4  ;;  %s3411_s18 = smov [#allocation10]   ;;  %s53_s17 = int_to_ptr.vmem [resolvable:$true] %s52_s17 }
  0x12   :  { %55 = dma.hbm_to_vmem [thread:$0]  %s51_s11, 64, %s53_s17, [#allocation6]  }
  0x13   :  { %s77_s19 = sshll.u32 %s3411_s18, 4  ;;  %s103_s2 = sshll.u32 %s3585_s8, 4  ;;  %s78_s19 = int_to_ptr.vmem [resolvable:$true] %s77_s19  ;;  %s104_s2 = int_to_ptr.hbm [resolvable:$true] %s103_s2 }
  0x14   :  { %83 = dma.hbm_to_vmem [thread:$0]  %s76_s13, 4096, %s78_s19, [#allocation9], %s3406_s23, %s3406_s23, %s3407_s24  }
  0x15   :  { %s3412_s1 = smov [#allocation13]  }
  0x16   :  { %s105_s22 = sshll.u32 %s3412_s1, 4  ;;  %s106_s22 = int_to_ptr.vmem [resolvable:$true] %s105_s22 }
  0x17   :  { %111 = dma.hbm_to_vmem [thread:$0]  %s104_s2, 4096, %s106_s22, [#allocation12], %s3406_s23, %s3406_s23, %s3407_s24  }
  0x18   :  { %3392 = dma.done.wait [#allocation3], 256  }
  0x19   :  { %3393 = vsyncadd [#allocation3], 4294967040 }
  0x1a   :  { %3394 = dma.done.wait [#allocation6], 8256  }
  0x1b   :  { %3395 = vsyncadd [#allocation6], 4294959040 }
  0x1c   :  { %3396 = dma.done.wait [#allocation9], 12288  }
  0x1d   :  { %3397 = vsyncadd [#allocation9], 4294955008 }
  0x1e   :  { %3398 = dma.done.wait [#allocation12], 8192  }
  0x1f   :  { %3399 = vsyncadd [#allocation12], 4294959104  ;;  %v2156_v0 = vld [vmem:[#allocation5 + $0xe0] sm:$0xf]  ;;  %v2970_v1 = vld [vmem:[#allocation5 + $0xec] sm:$0xf0] }
  0x20   :  { %v2284_v2 = vld [vmem:[#allocation5 + $0x1e0] sm:$0xf]  ;;  %v2157_v3 = vor.u32 %v2970_v1, %v2156_v0  ;;  %v3002_v4 = vld [vmem:[#allocation5 + $0x1ec] sm:$0xf0]  ;;  %v2968_v5 = vld [vmem:[#allocation5 + $0xe4] sm:$0xf] }
  0x21   :  { %v2158_v6 = vld [vmem:[#allocation5 + $0xf0] sm:$0xf0]  ;;  %v2285_v7 = vor.u32 %v3002_v4, %v2284_v2  ;;  %v3000_v9 = vld [vmem:[#allocation5 + $0x1e4] sm:$0xf]  ;;  %v2140_v11 = vld [vmem:[#allocation5 + $0xc0] sm:$0xf] }
  0x22   :  { %v2161_v8 = vor.u32 %v2968_v5, %v2158_v6  ;;  %v2286_v10 = vld [vmem:[#allocation5 + $0x1f0] sm:$0xf0]  ;;  %546 = vmatpush.bf16.msra.mxu0 %v2157_v3  ;;  %v2966_v13 = vld [vmem:[#allocation5 + $0xcc] sm:$0xf0]  ;;  %v2268_v14 = vld [vmem:[#allocation5 + $0x1c0] sm:$0xf] }
  0x23   :  { %v2289_v12 = vor.u32 %v3000_v9, %v2286_v10  ;;  %v2998_v15 = vld [vmem:[#allocation5 + $0x1cc] sm:$0xf0]  ;;  %560 = vmatpush.bf16.msra.mxu1 %v2285_v7  ;;  %v2141_v16 = vor.u32 %v2966_v13, %v2140_v11  ;;  %v2964_v18 = vld [vmem:[#allocation5 + $0xc4] sm:$0xf]  ;;  %v2142_v19 = vld [vmem:[#allocation5 + $0xd0] sm:$0xf0] }
  0x24   :  { %574 = vmatpush.bf16.msra.mxu2 %v2161_v8  ;;  %v2269_v17 = vor.u32 %v2998_v15, %v2268_v14  ;;  %v2996_v20 = vld [vmem:[#allocation5 + $0x1c4] sm:$0xf]  ;;  %v2145_v21 = vor.u32 %v2964_v18, %v2142_v19  ;;  %v2270_v22 = vld [vmem:[#allocation5 + $0x1d0] sm:$0xf0]  ;;  %v2124_v23 = vld [vmem:[#allocation5 + $0xa0] sm:$0xf] }
  0x25   :  { %588 = vmatpush.bf16.msra.mxu3 %v2289_v12  ;;  %v2962_v24 = vld [vmem:[#allocation5 + $0xac] sm:$0xf0]  ;;  %v2273_v25 = vor.u32 %v2996_v20, %v2270_v22  ;;  %v2252_v26 = vld [vmem:[#allocation5 + $0x1a0] sm:$0xf]  ;;  %v2960_v28 = vld [vmem:[#allocation5 + $0xa4] sm:$0xf] }
  0x26   :  { %v2994_v27 = vld [vmem:[#allocation5 + $0x1ac] sm:$0xf0]  ;;  %547 = vmatpush.bf16.msra.mxu0 %v2141_v16  ;;  %v2125_v29 = vor.u32 %v2962_v24, %v2124_v23  ;;  %v2126_v30 = vld [vmem:[#allocation5 + $0xb0] sm:$0xf0]  ;;  %v2992_v31 = vld [vmem:[#allocation5 + $0x1a4] sm:$0xf] }
  0x27   :  { %v2254_v32 = vld [vmem:[#allocation5 + $0x1b0] sm:$0xf0]  ;;  %561 = vmatpush.bf16.msra.mxu1 %v2269_v17  ;;  %v2253_v33 = vor.u32 %v2994_v27, %v2252_v26  ;;  %v2129_v34 = vor.u32 %v2960_v28, %v2126_v30  ;;  %v2108_v35 = vld [vmem:[#allocation5 + $0x80] sm:$0xf]  ;;  %v2958_v36 = vld [vmem:[#allocation5 + $0x8c] sm:$0xf0] }
  0x28   :  { %575 = vmatpush.bf16.msra.mxu2 %v2145_v21  ;;  %v2236_v37 = vld [vmem:[#allocation5 + $0x180] sm:$0xf]  ;;  %v2257_v38 = vor.u32 %v2992_v31, %v2254_v32  ;;  %v2990_v39 = vld [vmem:[#allocation5 + $0x18c] sm:$0xf0]  ;;  %v2956_v40 = vld [vmem:[#allocation5 + $0x84] sm:$0xf]  ;;  %v2109_v44 = vor.u32 %v2958_v36, %v2108_v35 }
  0x29   :  { %589 = vmatpush.bf16.msra.mxu3 %v2273_v25  ;;  %v2110_v41 = vld [vmem:[#allocation5 + $0x90] sm:$0xf0]  ;;  %v2988_v42 = vld [vmem:[#allocation5 + $0x184] sm:$0xf]  ;;  %v2237_v45 = vor.u32 %v2990_v39, %v2236_v37  ;;  %v2092_v47 = vld [vmem:[#allocation5 + $0x60] sm:$0xf] }
  0x2a   :  { %v2238_v43 = vld [vmem:[#allocation5 + $0x190] sm:$0xf0]  ;;  %548 = vmatpush.bf16.msra.mxu0 %v2125_v29  ;;  %v2113_v46 = vor.u32 %v2956_v40, %v2110_v41  ;;  %v2954_v48 = vld [vmem:[#allocation5 + $0x6c] sm:$0xf0]  ;;  %v2220_v49 = vld [vmem:[#allocation5 + $0x160] sm:$0xf] }
  0x2b   :  { %562 = vmatpush.bf16.msra.mxu1 %v2253_v33  ;;  %v2241_v50 = vor.u32 %v2988_v42, %v2238_v43  ;;  %v2986_v51 = vld [vmem:[#allocation5 + $0x16c] sm:$0xf0]  ;;  %v2952_v52 = vld [vmem:[#allocation5 + $0x64] sm:$0xf]  ;;  %v2094_v53 = vld [vmem:[#allocation5 + $0x70] sm:$0xf0]  ;;  %v2093_v56 = vor.u32 %v2954_v48, %v2092_v47 }
  0x2c   :  { %576 = vmatpush.bf16.msra.mxu2 %v2129_v34  ;;  %v2984_v54 = vld [vmem:[#allocation5 + $0x164] sm:$0xf]  ;;  %v2222_v55 = vld [vmem:[#allocation5 + $0x170] sm:$0xf0]  ;;  %v2221_v57 = vor.u32 %v2986_v51, %v2220_v49  ;;  %v2097_v58 = vor.u32 %v2952_v52, %v2094_v53  ;;  %v2076_v59 = vld [vmem:[#allocation5 + $0x40] sm:$0xf] }
  0x2d   :  { %590 = vmatpush.bf16.msra.mxu3 %v2257_v38  ;;  %v2950_v60 = vld [vmem:[#allocation5 + $0x4c] sm:$0xf0]  ;;  %v2204_v61 = vld [vmem:[#allocation5 + $0x140] sm:$0xf]  ;;  %v2225_v62 = vor.u32 %v2984_v54, %v2222_v55  ;;  %v2948_v0 = vld [vmem:[#allocation5 + $0x44] sm:$0xf] }
  0x2e   :  { %549 = vmatpush.bf16.msra.mxu0 %v2109_v44  ;;  %v2982_v63 = vld [vmem:[#allocation5 + $0x14c] sm:$0xf0]  ;;  %v2078_v1 = vld [vmem:[#allocation5 + $0x50] sm:$0xf0]  ;;  %v2980_v2 = vld [vmem:[#allocation5 + $0x144] sm:$0xf]  ;;  %v2077_v4 = vor.u32 %v2950_v60, %v2076_v59 }
  0x2f   :  { %563 = vmatpush.bf16.msra.mxu1 %v2237_v45  ;;  %v2206_v3 = vld [vmem:[#allocation5 + $0x150] sm:$0xf0]  ;;  %v2205_v5 = vor.u32 %v2982_v63, %v2204_v61  ;;  %v2081_v6 = vor.u32 %v2948_v0, %v2078_v1  ;;  %v2060_v7 = vld [vmem:[#allocation5 + $0x20] sm:$0xf]  ;;  %v2946_v8 = vld [vmem:[#allocation5 + $0x2c] sm:$0xf0] }
  0x30   :  { %577 = vmatpush.bf16.msra.mxu2 %v2113_v46  ;;  %v2188_v9 = vld [vmem:[#allocation5 + $0x120] sm:$0xf]  ;;  %v2209_v10 = vor.u32 %v2980_v2, %v2206_v3  ;;  %v2978_v11 = vld [vmem:[#allocation5 + $0x12c] sm:$0xf0]  ;;  %v2944_v12 = vld [vmem:[#allocation5 + $0x24] sm:$0xf]  ;;  %v2061_v16 = vor.u32 %v2946_v8, %v2060_v7 }
  0x31   :  { %591 = vmatpush.bf16.msra.mxu3 %v2241_v50  ;;  %v2062_v13 = vld [vmem:[#allocation5 + $0x30] sm:$0xf0]  ;;  %v2976_v14 = vld [vmem:[#allocation5 + $0x124] sm:$0xf]  ;;  %v2044_v17 = vld [vmem:[#allocation5] sm:$0xf]  ;;  %v2189_v20 = vor.u32 %v2978_v11, %v2188_v9 }
  0x32   :  { %550 = vmatpush.bf16.msra.mxu0 %v2093_v56  ;;  %v2190_v15 = vld [vmem:[#allocation5 + $0x130] sm:$0xf0]  ;;  %v2942_v18 = vld [vmem:[#allocation5 + $0xc] sm:$0xf0]  ;;  %v2172_v19 = vld [vmem:[#allocation5 + $0x100] sm:$0xf]  ;;  %v2065_v21 = vor.u32 %v2944_v12, %v2062_v13 }
  0x33   :  { %564 = vmatpush.bf16.msra.mxu1 %v2221_v57  ;;  %v2974_v22 = vld [vmem:[#allocation5 + $0x10c] sm:$0xf0]  ;;  %v2940_v23 = vld [vmem:[#allocation5 + $0x4] sm:$0xf]  ;;  %v2046_v24 = vld [vmem:[#allocation5 + $0x10] sm:$0xf0]  ;;  %v2193_v25 = vor.u32 %v2976_v14, %v2190_v15  ;;  %v2045_v32 = vor.u32 %v2942_v18, %v2044_v17 }
  0x34   :  { %578 = vmatpush.bf16.msra.mxu2 %v2097_v58  ;;  %v2972_v26 = vld [vmem:[#allocation5 + $0x104] sm:$0xf]  ;;  %v2174_v27 = vld [vmem:[#allocation5 + $0x110] sm:$0xf0]  ;;  %v2164_v28 = vld [vmem:[#allocation5 + $0xe8] sm:$0xf]  ;;  %v2173_v36 = vor.u32 %v2974_v22, %v2172_v19  ;;  %v2049_v37 = vor.u32 %v2940_v23, %v2046_v24 }
  0x35   :  { %592 = vmatpush.bf16.msra.mxu3 %v2225_v62  ;;  %v2971_v29 = vld [vmem:[#allocation5 + $0xf4] sm:$0xf0]  ;;  %v2292_v30 = vld [vmem:[#allocation5 + $0x1e8] sm:$0xf]  ;;  %v2969_v33 = vld [vmem:[#allocation5 + $0xec] sm:$0xf]  ;;  %v2177_v41 = vor.u32 %v2972_v26, %v2174_v27 }
  0x36   :  { %551 = vmatpush.bf16.msra.mxu0 %v2077_v4  ;;  %v3003_v31 = vld [vmem:[#allocation5 + $0x1f4] sm:$0xf0]  ;;  %v2166_v34 = vld [vmem:[#allocation5 + $0xf8] sm:$0xf0]  ;;  %v3001_v35 = vld [vmem:[#allocation5 + $0x1ec] sm:$0xf]  ;;  %v2165_v42 = vor.u32 %v2971_v29, %v2164_v28 }
  0x37   :  { %565 = vmatpush.bf16.msra.mxu1 %v2205_v5  ;;  %v2294_v38 = vld [vmem:[#allocation5 + $0x1f8] sm:$0xf0]  ;;  %v2036_v39 = vld [vmem:[#allocation2] sm:$0xf]  ;;  %v2939_v40 = vld [vmem:[#allocation2 + $0x4] sm:$0xf0]  ;;  %v2293_v45 = vor.u32 %v3003_v31, %v2292_v30  ;;  %v2169_v46 = vor.u32 %v2969_v33, %v2166_v34 }
  0x38   :  { %579 = vmatpush.bf16.msra.mxu2 %v2081_v6  ;;  %v2938_v43 = vld [vmem:[#allocation2 + $0x4] sm:$0xf]  ;;  %v2038_v44 = vld [vmem:[#allocation2 + $0x8] sm:$0xf0]  ;;  %v2148_v47 = vld [vmem:[#allocation5 + $0xc8] sm:$0xf]  ;;  %v2297_v50 = vor.u32 %v3001_v35, %v2294_v38  ;;  %v3503_v51 = vor.u32 %v2939_v40, %v2036_v39 }
  0x39   :  { %593 = vmatpush.bf16.msra.mxu3 %v2209_v10  ;;  %v2967_v48 = vld [vmem:[#allocation5 + $0xd4] sm:$0xf0]  ;;  %v2276_v49 = vld [vmem:[#allocation5 + $0x1c8] sm:$0xf]  ;;  %v2965_v53 = vld [vmem:[#allocation5 + $0xcc] sm:$0xf]  ;;  %v3505_v55 = vor.u32 %v2938_v43, %v2038_v44 }
  0x3a   :  { %552 = vmatpush.bf16.msra.mxu0 %v2061_v16  ;;  %v2999_v52 = vld [vmem:[#allocation5 + $0x1d4] sm:$0xf0]  ;;  %v2150_v54 = vld [vmem:[#allocation5 + $0xd8] sm:$0xf0]  ;;  %v2997_v56 = vld [vmem:[#allocation5 + $0x1cc] sm:$0xf]  ;;  %v2149_v58 = vor.u32 %v2967_v48, %v2148_v47 }
  0x3b   :  { %566 = vmatpush.bf16.msra.mxu1 %v2189_v20  ;;  %v2278_v57 = vld [vmem:[#allocation5 + $0x1d8] sm:$0xf0]  ;;  %v2277_v59 = vor.u32 %v2999_v52, %v2276_v49  ;;  %v2153_v60 = vor.u32 %v2965_v53, %v2150_v54  ;;  %v2132_v61 = vld [vmem:[#allocation5 + $0xa8] sm:$0xf]  ;;  %v2963_v62 = vld [vmem:[#allocation5 + $0xb4] sm:$0xf0] }
  0x3c   :  { %580 = vmatpush.bf16.msra.mxu2 %v2065_v21  ;;  %v2260_v63 = vld [vmem:[#allocation5 + $0x1a8] sm:$0xf]  ;;  %v2281_v0 = vor.u32 %v2997_v56, %v2278_v57  ;;  %v2995_v1 = vld [vmem:[#allocation5 + $0x1b4] sm:$0xf0]  ;;  %v2961_v2 = vld [vmem:[#allocation5 + $0xac] sm:$0xf]  ;;  %v2133_v6 = vor.u32 %v2963_v62, %v2132_v61 }
  0x3d   :  { %594 = vmatpush.bf16.msra.mxu3 %v2193_v25  ;;  %v2134_v3 = vld [vmem:[#allocation5 + $0xb8] sm:$0xf0]  ;;  %v2993_v4 = vld [vmem:[#allocation5 + $0x1ac] sm:$0xf]  ;;  %v2261_v7 = vor.u32 %v2995_v1, %v2260_v63  ;;  %v2116_v9 = vld [vmem:[#allocation5 + $0x88] sm:$0xf] }
  0x3e   :  { %553 = vmatpush.bf16.msra.mxu0 %v2045_v32  ;;  %v2262_v5 = vld [vmem:[#allocation5 + $0x1b8] sm:$0xf0]  ;;  %v2137_v8 = vor.u32 %v2961_v2, %v2134_v3  ;;  %v2959_v10 = vld [vmem:[#allocation5 + $0x94] sm:$0xf0]  ;;  %v2244_v11 = vld [vmem:[#allocation5 + $0x188] sm:$0xf] }
  0x3f   :  { %567 = vmatpush.bf16.msra.mxu1 %v2173_v36  ;;  %v2265_v12 = vor.u32 %v2993_v4, %v2262_v5  ;;  %v2991_v13 = vld [vmem:[#allocation5 + $0x194] sm:$0xf0]  ;;  %v2957_v14 = vld [vmem:[#allocation5 + $0x8c] sm:$0xf]  ;;  %v2118_v15 = vld [vmem:[#allocation5 + $0x98] sm:$0xf0]  ;;  %v2117_v18 = vor.u32 %v2959_v10, %v2116_v9 }
  0x40   :  { %581 = vmatpush.bf16.msra.mxu2 %v2049_v37  ;;  %v2989_v16 = vld [vmem:[#allocation5 + $0x18c] sm:$0xf]  ;;  %v2246_v17 = vld [vmem:[#allocation5 + $0x198] sm:$0xf0]  ;;  %v2245_v19 = vor.u32 %v2991_v13, %v2244_v11  ;;  %v2121_v20 = vor.u32 %v2957_v14, %v2118_v15  ;;  %v2100_v21 = vld [vmem:[#allocation5 + $0x68] sm:$0xf] }
  0x41   :  { %595 = vmatpush.bf16.msra.mxu3 %v2177_v41  ;;  %554 = vmatmul.bf16.vlgmr.msra.gmra.mxu0 %v3503_v51  ;;  %v2955_v22 = vld [vmem:[#allocation5 + $0x74] sm:$0xf0]  ;;  %v2228_v23 = vld [vmem:[#allocation5 + $0x168] sm:$0xf]  ;;  %v2249_v24 = vor.u32 %v2989_v16, %v2246_v17  ;;  %v2953_v26 = vld [vmem:[#allocation5 + $0x6c] sm:$0xf] }
  0x42   :  { %602 = vmatpush.bf16.msrb.mxu0 %v2165_v42  ;;  %568 = vmatmul.bf16.vlgmr.msra.gmra.mxu1 %v3505_v55  ;;  %v2987_v25 = vld [vmem:[#allocation5 + $0x174] sm:$0xf0]  ;;  %v2102_v27 = vld [vmem:[#allocation5 + $0x78] sm:$0xf0]  ;;  %v2985_v28 = vld [vmem:[#allocation5 + $0x16c] sm:$0xf]  ;;  %v2101_v30 = vor.u32 %v2955_v22, %v2100_v21 }
  0x43   :  { %616 = vmatpush.bf16.msrb.mxu1 %v2293_v45  ;;  %582 = vmatmul.bf16.vlgmr.msra.gmra.mxu2 %v3503_v51  ;;  %v2230_v29 = vld [vmem:[#allocation5 + $0x178] sm:$0xf0]  ;;  %v2229_v31 = vor.u32 %v2987_v25, %v2228_v23  ;;  %v2105_v32 = vor.u32 %v2953_v26, %v2102_v27  ;;  %v2084_v33 = vld [vmem:[#allocation5 + $0x48] sm:$0xf]  ;;  %v2951_v34 = vld [vmem:[#allocation5 + $0x54] sm:$0xf0] }
  0x44   :  { %630 = vmatpush.bf16.msrb.mxu2 %v2169_v46  ;;  %596 = vmatmul.bf16.vlgmr.msra.gmra.mxu3 %v3505_v55  ;;  %v2212_v35 = vld [vmem:[#allocation5 + $0x148] sm:$0xf]  ;;  %v2233_v36 = vor.u32 %v2985_v28, %v2230_v29  ;;  %v2983_v37 = vld [vmem:[#allocation5 + $0x154] sm:$0xf0]  ;;  %v2949_v38 = vld [vmem:[#allocation5 + $0x4c] sm:$0xf]  ;;  %v2085_v42 = vor.u32 %v2951_v34, %v2084_v33 }
  0x45   :  { %644 = vmatpush.bf16.msrb.mxu3 %v2297_v50  ;;  %v2086_v39 = vld [vmem:[#allocation5 + $0x58] sm:$0xf0]  ;;  %v2981_v40 = vld [vmem:[#allocation5 + $0x14c] sm:$0xf]  ;;  %v2213_v43 = vor.u32 %v2983_v37, %v2212_v35  ;;  %v2068_v45 = vld [vmem:[#allocation5 + $0x28] sm:$0xf] }
  0x46   :  { %603 = vmatpush.bf16.msrb.mxu0 %v2149_v58  ;;  %v2214_v41 = vld [vmem:[#allocation5 + $0x158] sm:$0xf0]  ;;  %v2089_v44 = vor.u32 %v2949_v38, %v2086_v39  ;;  %v2947_v46 = vld [vmem:[#allocation5 + $0x34] sm:$0xf0]  ;;  %v2196_v47 = vld [vmem:[#allocation5 + $0x128] sm:$0xf] }
  0x47   :  { %617 = vmatpush.bf16.msrb.mxu1 %v2277_v59  ;;  %v2217_v48 = vor.u32 %v2981_v40, %v2214_v41  ;;  %v2979_v49 = vld [vmem:[#allocation5 + $0x134] sm:$0xf0]  ;;  %v2945_v50 = vld [vmem:[#allocation5 + $0x2c] sm:$0xf]  ;;  %v2070_v52 = vld [vmem:[#allocation5 + $0x38] sm:$0xf0]  ;;  %v2069_v56 = vor.u32 %v2947_v46, %v2068_v45 }
  0x48   :  { %631 = vmatpush.bf16.msrb.mxu2 %v2153_v60  ;;  %v2977_v53 = vld [vmem:[#allocation5 + $0x12c] sm:$0xf]  ;;  %v2198_v54 = vld [vmem:[#allocation5 + $0x138] sm:$0xf0]  ;;  %v2052_v57 = vld [vmem:[#allocation5 + $0x8] sm:$0xf]  ;;  %v2197_v58 = vor.u32 %v2979_v49, %v2196_v47  ;;  %v2073_v59 = vor.u32 %v2945_v50, %v2070_v52 }
  0x49   :  { %645 = vmatpush.bf16.msrb.mxu3 %v2281_v0  ;;  %v2943_v60 = vld [vmem:[#allocation5 + $0x14] sm:$0xf0]  ;;  %v2180_v61 = vld [vmem:[#allocation5 + $0x108] sm:$0xf]  ;;  %v2201_v63 = vor.u32 %v2977_v53, %v2198_v54  ;;  %v2941_v0 = vld [vmem:[#allocation5 + $0xc] sm:$0xf] }
  0x4a   :  { %604 = vmatpush.bf16.msrb.mxu0 %v2133_v6  ;;  %v2975_v62 = vld [vmem:[#allocation5 + $0x114] sm:$0xf0]  ;;  %v2054_v1 = vld [vmem:[#allocation5 + $0x18] sm:$0xf0]  ;;  %v2973_v2 = vld [vmem:[#allocation5 + $0x10c] sm:$0xf]  ;;  %v2053_v6 = vor.u32 %v2943_v60, %v2052_v57 }
  0x4b   :  { %618 = vmatpush.bf16.msrb.mxu1 %v2261_v7  ;;  %v2182_v3 = vld [vmem:[#allocation5 + $0x118] sm:$0xf0]  ;;  %v2356_v4 = vld [vmem:[#allocation8 + $0x70] sm:$0xf]  ;;  %v2181_v9 = vor.u32 %v2975_v62, %v2180_v61  ;;  %v2057_v10 = vor.u32 %v2941_v0, %v2054_v1  ;;  %v2348_v13 = vld [vmem:[#allocation8 + $0x60] sm:$0xf] }
  0x4c   :  { %632 = vmatpush.bf16.msrb.mxu2 %v2137_v8  ;;  %v3019_v5 = vld [vmem:[#allocation8 + $0x74] sm:$0xf0]  ;;  %v2420_v7 = vld [vmem:[#allocation8 + $0xf0] sm:$0xf]  ;;  %v2185_v11 = vor.u32 %v2973_v2, %v2182_v3  ;;  %v3017_v14 = vld [vmem:[#allocation8 + $0x64] sm:$0xf0] }
  0x4d   :  { %646 = vmatpush.bf16.msrb.mxu3 %v2265_v12  ;;  %v3035_v8 = vld [vmem:[#allocation8 + $0xf4] sm:$0xf0]  ;;  %v2357_v12 = vor.u32 %v3019_v5, %v2356_v4  ;;  %v2412_v16 = vld [vmem:[#allocation8 + $0xe0] sm:$0xf]  ;;  %v3033_v17 = vld [vmem:[#allocation8 + $0xe4] sm:$0xf0] }
  0x4e   :  { %605 = vmatpush.bf16.msrb.mxu0 %v2117_v18  ;;  %v2421_v15 = vor.u32 %v3035_v8, %v2420_v7  ;;  %v2349_v18 = vor.u32 %v3017_v14, %v2348_v13  ;;  %v2413_v21 = vor.u32 %v3033_v17, %v2412_v16  ;;  %v2404_v22 = vld [vmem:[#allocation8 + $0xd0] sm:$0xf]  ;;  %v3031_v23 = vld [vmem:[#allocation8 + $0xd4] sm:$0xf0]  ;;  %v2332_v25 = vld [vmem:[#allocation8 + $0x40] sm:$0xf] }
  0x4f   :  { %619 = vmatpush.bf16.msrb.mxu1 %v2245_v19  ;;  %v2340_v19 = vld [vmem:[#allocation8 + $0x50] sm:$0xf]  ;;  %v3013_v26 = vld [vmem:[#allocation8 + $0x44] sm:$0xf0]  ;;  %v2405_v27 = vor.u32 %v3031_v23, %v2404_v22  ;;  %v2396_v28 = vld [vmem:[#allocation8 + $0xc0] sm:$0xf] }
  0x50   :  { %633 = vmatpush.bf16.msrb.mxu2 %v2121_v20  ;;  %v3015_v20 = vld [vmem:[#allocation8 + $0x54] sm:$0xf0]  ;;  %v3029_v29 = vld [vmem:[#allocation8 + $0xc4] sm:$0xf0]  ;;  %v2388_v34 = vld [vmem:[#allocation8 + $0xb0] sm:$0xf] }
  0x51   :  { %647 = vmatpush.bf16.msrb.mxu3 %v2249_v24  ;;  %v2341_v24 = vor.u32 %v3015_v20, %v2340_v19  ;;  %v2397_v33 = vor.u32 %v3029_v29, %v2396_v28  ;;  %v2380_v38 = vld [vmem:[#allocation8 + $0xa0] sm:$0xf]  ;;  %v3025_v39 = vld [vmem:[#allocation8 + $0xa4] sm:$0xf0]  ;;  %v2308_v41 = vld [vmem:[#allocation8 + $0x10] sm:$0xf] }
  0x52   :  { %606 = vmatpush.bf16.msrb.mxu0 %v2101_v30  ;;  %v2333_v30 = vor.u32 %v3013_v26, %v2332_v25  ;;  %v2300_v45 = vld [vmem:[#allocation8] sm:$0xf]  ;;  %v3005_v46 = vld [vmem:[#allocation8 + $0x4] sm:$0xf0]  ;;  %v3051_v49 = vld [vmem:[#allocation8 + $0x174] sm:$0xf0] }
  0x53   :  { %620 = vmatpush.bf16.msrb.mxu1 %v2229_v31  ;;  %v2324_v31 = vld [vmem:[#allocation8 + $0x30] sm:$0xf]  ;;  %v2301_v47 = vor.u32 %v3005_v46, %v2300_v45  ;;  %v3018_v50 = vld [vmem:[#allocation8 + $0x74] sm:$0xf]  ;;  %v2358_v53 = vld [vmem:[#allocation8 + $0x78] sm:$0xf0] }
  0x54   :  { %634 = vmatpush.bf16.msrb.mxu2 %v2105_v32  ;;  %v3011_v32 = vld [vmem:[#allocation8 + $0x34] sm:$0xf0]  ;;  %v2372_v54 = vld [vmem:[#allocation8 + $0x90] sm:$0xf]  ;;  %v2361_v57 = vor.u32 %v3018_v50, %v2358_v53  ;;  %v3049_v60 = vld [vmem:[#allocation8 + $0x164] sm:$0xf0] }
  0x55   :  { %648 = vmatpush.bf16.msrb.mxu3 %v2233_v36  ;;  %v2325_v35 = vor.u32 %v3011_v32, %v2324_v31  ;;  %v3009_v36 = vld [vmem:[#allocation8 + $0x24] sm:$0xf0]  ;;  %v3016_v62 = vld [vmem:[#allocation8 + $0x64] sm:$0xf]  ;;  %v2364_v0 = vld [vmem:[#allocation8 + $0x80] sm:$0xf] }
  0x56   :  { %607 = vmatpush.bf16.msrb.mxu0 %v2085_v42  ;;  %v3007_v42 = vld [vmem:[#allocation8 + $0x14] sm:$0xf0]  ;;  %v3021_v2 = vld [vmem:[#allocation8 + $0x84] sm:$0xf0]  ;;  %v2548_v3 = vld [vmem:[#allocation8 + $0x1f0] sm:$0xf] }
  0x57   :  { %621 = vmatpush.bf16.msrb.mxu1 %v2213_v43  ;;  %v2381_v43 = vor.u32 %v3025_v39, %v2380_v38  ;;  %v3067_v4 = vld [vmem:[#allocation8 + $0x1f4] sm:$0xf0]  ;;  %v2365_v5 = vor.u32 %v3021_v2, %v2364_v0  ;;  %v3034_v7 = vld [vmem:[#allocation8 + $0xf4] sm:$0xf]  ;;  %v2422_v8 = vld [vmem:[#allocation8 + $0xf8] sm:$0xf0] }
  0x58   :  { %635 = vmatpush.bf16.msrb.mxu2 %v2089_v44  ;;  %v2309_v44 = vor.u32 %v3007_v42, %v2308_v41  ;;  %v2342_v14 = vld [vmem:[#allocation8 + $0x58] sm:$0xf0]  ;;  %v2540_v16 = vld [vmem:[#allocation8 + $0x1e0] sm:$0xf]  ;;  %v3065_v17 = vld [vmem:[#allocation8 + $0x1e4] sm:$0xf0] }
  0x59   :  { %649 = vmatpush.bf16.msrb.mxu3 %v2217_v48  ;;  %v2484_v48 = vld [vmem:[#allocation8 + $0x170] sm:$0xf]  ;;  %v2541_v19 = vor.u32 %v3065_v17, %v2540_v16  ;;  %v2414_v20 = vld [vmem:[#allocation8 + $0xe8] sm:$0xf0]  ;;  %v2460_v22 = vld [vmem:[#allocation8 + $0x140] sm:$0xf] }
  0x5a   :  { %608 = vmatpush.bf16.msrb.mxu0 %v2069_v56  ;;  %v2485_v52 = vor.u32 %v3051_v49, %v2484_v48  ;;  %v3023_v56 = vld [vmem:[#allocation8 + $0x94] sm:$0xf0]  ;;  %v3045_v23 = vld [vmem:[#allocation8 + $0x144] sm:$0xf0]  ;;  %v2334_v26 = vld [vmem:[#allocation8 + $0x48] sm:$0xf0] }
  0x5b   :  { %622 = vmatpush.bf16.msrb.mxu1 %v2197_v58  ;;  %v2373_v58 = vor.u32 %v3023_v56, %v2372_v54  ;;  %v2461_v25 = vor.u32 %v3045_v23, %v2460_v22  ;;  %v2532_v28 = vld [vmem:[#allocation8 + $0x1d0] sm:$0xf]  ;;  %v3063_v29 = vld [vmem:[#allocation8 + $0x1d4] sm:$0xf0]  ;;  %v2406_v32 = vld [vmem:[#allocation8 + $0xd8] sm:$0xf0] }
  0x5c   :  { %636 = vmatpush.bf16.msrb.mxu2 %v2073_v59  ;;  %v2476_v59 = vld [vmem:[#allocation8 + $0x160] sm:$0xf]  ;;  %v2533_v31 = vor.u32 %v3063_v29, %v2532_v28  ;;  %v3061_v39 = vld [vmem:[#allocation8 + $0x1c4] sm:$0xf0]  ;;  %v2398_v42 = vld [vmem:[#allocation8 + $0xc8] sm:$0xf0] }
  0x5d   :  { %650 = vmatpush.bf16.msrb.mxu3 %v2201_v63  ;;  %v2477_v61 = vor.u32 %v3049_v60, %v2476_v59  ;;  %v2350_v63 = vld [vmem:[#allocation8 + $0x68] sm:$0xf0]  ;;  %v2524_v38 = vld [vmem:[#allocation8 + $0x1c0] sm:$0xf]  ;;  %v3041_v45 = vld [vmem:[#allocation8 + $0x124] sm:$0xf0] }
  0x5e   :  { %609 = vmatpush.bf16.msrb.mxu0 %v2053_v6  ;;  %v2353_v1 = vor.u32 %v3016_v62, %v2350_v63  ;;  %v2549_v6 = vor.u32 %v3067_v4, %v2548_v3  ;;  %v2525_v41 = vor.u32 %v3061_v39, %v2524_v38  ;;  %v3008_v46 = vld [vmem:[#allocation8 + $0x24] sm:$0xf]  ;;  %v2318_v48 = vld [vmem:[#allocation8 + $0x28] sm:$0xf0]  ;;  %v3515_v49 = vld [vmem:[#allocation7] sm:$0xf] }
  0x5f   :  { %623 = vmatpush.bf16.msrb.mxu1 %v2181_v9  ;;  %v2425_v9 = vor.u32 %v3034_v7, %v2422_v8  ;;  %v2321_v50 = vor.u32 %v3008_v46, %v2318_v48  ;;  %v3059_v53 = vld [vmem:[#allocation8 + $0x1b4] sm:$0xf0]  ;;  %v3026_v54 = vld [vmem:[#allocation8 + $0xb4] sm:$0xf]  ;;  %v2310_v63 = vld [vmem:[#allocation8 + $0x18] sm:$0xf0] }
  0x60   :  { %637 = vmatpush.bf16.msrb.mxu2 %v2057_v10  ;;  %v2468_v10 = vld [vmem:[#allocation8 + $0x150] sm:$0xf]  ;;  %v3039_v59 = vld [vmem:[#allocation8 + $0x114] sm:$0xf0]  ;;  %v3006_v62 = vld [vmem:[#allocation8 + $0x14] sm:$0xf] }
  0x61   :  { %651 = vmatpush.bf16.msrb.mxu3 %v2185_v11  ;;  %610 = vmatmul.bf16.vlgmr.msrb.gmra.mxu0 %v3503_v51  ;;  %v3047_v11 = vld [vmem:[#allocation8 + $0x154] sm:$0xf0]  ;;  %v2508_v0 = vld [vmem:[#allocation8 + $0x1a0] sm:$0xf]  ;;  %v3057_v2 = vld [vmem:[#allocation8 + $0x1a4] sm:$0xf0] }
  0x62   :  { %1060 = vmatpush.bf16.msra.mxu0 %v2357_v12  ;;  %624 = vmatmul.bf16.vlgmr.msrb.gmra.mxu1 %v3505_v55  ;;  %v3014_v12 = vld [vmem:[#allocation8 + $0x54] sm:$0xf]  ;;  %v2469_v13 = vor.u32 %v3047_v11, %v2468_v10  ;;  %v3024_v3 = vld [vmem:[#allocation8 + $0xa4] sm:$0xf]  ;;  %v2382_v4 = vld [vmem:[#allocation8 + $0xa8] sm:$0xf0] }
  0x63   :  { %1074 = vmatpush.bf16.msra.mxu1 %v2421_v15  ;;  %638 = vmatmul.bf16.vlgmr.msrb.gmra.mxu2 %v3503_v51  ;;  %v3027_v51 = vld [vmem:[#allocation8 + $0xb4] sm:$0xf0]  ;;  %v2345_v15 = vor.u32 %v3014_v12, %v2342_v14  ;;  %v208_v7 = vperm.slane %v3515_v49, 0  ;;  %v2428_v8 = vld [vmem:[#allocation8 + $0x100] sm:$0xf]  ;;  %s2018_s27 = sshll.u32 %s3586_s9, 4  ;;  %s2019_s27 = int_to_ptr.hbm [resolvable:$true] %s2018_s27 }
  0x64   :  { %652 = vmatmul.bf16.vlgmr.msrb.gmra.mxu3 %v3505_v55  ;;  %v2316_v55 = vld [vmem:[#allocation8 + $0x20] sm:$0xf]  ;;  %v2389_v37 = vor.u32 %v3027_v51, %v2388_v34  ;;  %1088 = vmatpush.bf16.msra.mxu2 %v2485_v52  ;;  %v2452_v34 = vld [vmem:[#allocation8 + $0x130] sm:$0xf]  ;;  %v3043_v51 = vld [vmem:[#allocation8 + $0x134] sm:$0xf0] }
  0x65   :  { %v2317_v40 = vor.u32 %v3009_v36, %v2316_v55  ;;  %1102 = vmatpush.bf16.msra.mxu3 %v2549_v6  ;;  %v2453_v55 = vor.u32 %v3043_v51, %v2452_v34  ;;  %v2326_v36 = vld [vmem:[#allocation8 + $0x38] sm:$0xf0]  ;;  %v2516_v52 = vld [vmem:[#allocation8 + $0x1b0] sm:$0xf]  ;;  %v2385_v6 = vor.u32 %v3024_v3, %v2382_v4  ;;  %v3004_v10 = vld [vmem:[#allocation8 + $0x4] sm:$0xf] }
  0x66   :  { %1061 = vmatpush.bf16.msra.mxu0 %v2349_v18  ;;  %v3032_v18 = vld [vmem:[#allocation8 + $0xe4] sm:$0xf]  ;;  %v2517_v56 = vor.u32 %v3059_v53, %v2516_v52  ;;  %v2302_v12 = vld [vmem:[#allocation8 + $0x8] sm:$0xf0]  ;;  %v2486_v14 = vld [vmem:[#allocation8 + $0x178] sm:$0xf0] }
  0x67   :  { %1075 = vmatpush.bf16.msra.mxu1 %v2413_v21  ;;  %v2417_v21 = vor.u32 %v3032_v18, %v2414_v20  ;;  %v2500_v17 = vld [vmem:[#allocation8 + $0x190] sm:$0xf]  ;;  %v3055_v18 = vld [vmem:[#allocation8 + $0x194] sm:$0xf0]  ;;  %v2374_v22 = vld [vmem:[#allocation8 + $0x98] sm:$0xf0] }
  0x68   :  { %1089 = vmatpush.bf16.msra.mxu2 %v2477_v61  ;;  %v2492_v29 = vld [vmem:[#allocation8 + $0x180] sm:$0xf]  ;;  %v3066_v34 = vld [vmem:[#allocation8 + $0x1f4] sm:$0xf]  ;;  %v2550_v51 = vld [vmem:[#allocation8 + $0x1f8] sm:$0xf0] }
  0x69   :  { %1103 = vmatpush.bf16.msra.mxu3 %v2541_v19  ;;  %v3022_v19 = vld [vmem:[#allocation8 + $0x94] sm:$0xf]  ;;  %v2470_v38 = vld [vmem:[#allocation8 + $0x158] sm:$0xf0]  ;;  %v3044_v52 = vld [vmem:[#allocation8 + $0x144] sm:$0xf] }
  0x6a   :  { %1062 = vmatpush.bf16.msra.mxu0 %v2341_v24  ;;  %v3012_v24 = vld [vmem:[#allocation8 + $0x44] sm:$0xf]  ;;  %v2462_v53 = vld [vmem:[#allocation8 + $0x148] sm:$0xf0] }
  0x6b   :  { %1076 = vmatpush.bf16.msra.mxu1 %v2405_v27  ;;  %v2337_v27 = vor.u32 %v3012_v24, %v2334_v26  ;;  %v2377_v24 = vor.u32 %v3022_v19, %v2374_v22  ;;  %v2478_v26 = vld [vmem:[#allocation8 + $0x168] sm:$0xf0]  ;;  %v2438_v19 = vld [vmem:[#allocation8 + $0x118] sm:$0xf0] }
  0x6c   :  { %1090 = vmatpush.bf16.msra.mxu2 %v2469_v13  ;;  %v3050_v13 = vld [vmem:[#allocation8 + $0x174] sm:$0xf] }
  0x6d   :  { %1104 = vmatpush.bf16.msra.mxu3 %v2533_v31  ;;  %v2489_v16 = vor.u32 %v3050_v13, %v2486_v14  ;;  %v3020_v31 = vld [vmem:[#allocation8 + $0x84] sm:$0xf] }
  0x6e   :  { %1063 = vmatpush.bf16.msra.mxu0 %v2333_v30  ;;  %v3030_v30 = vld [vmem:[#allocation8 + $0xd4] sm:$0xf] }
  0x6f   :  { %1077 = vmatpush.bf16.msra.mxu1 %v2397_v33  ;;  %v2409_v33 = vor.u32 %v3030_v30, %v2406_v32  ;;  %v3053_v30 = vld [vmem:[#allocation8 + $0x184] sm:$0xf0] }
  0x70   :  { %1091 = vmatpush.bf16.msra.mxu2 %v2461_v25  ;;  %v3048_v25 = vld [vmem:[#allocation8 + $0x164] sm:$0xf]  ;;  %v2493_v32 = vor.u32 %v3053_v30, %v2492_v29 }
  0x71   :  { %1105 = vmatpush.bf16.msra.mxu3 %v2525_v41  ;;  %v2481_v28 = vor.u32 %v3048_v25, %v2478_v26  ;;  %v2430_v25 = vld [vmem:[#allocation8 + $0x108] sm:$0xf0] }
  0x72   :  { %1064 = vmatpush.bf16.msra.mxu0 %v2325_v35  ;;  %v3010_v35 = vld [vmem:[#allocation8 + $0x34] sm:$0xf] }
  0x73   :  { %1078 = vmatpush.bf16.msra.mxu1 %v2389_v37  ;;  %v2329_v37 = vor.u32 %v3010_v35, %v2326_v36  ;;  %v209_v36 = vperm.slane %v3515_v49, 1 }
  0x74   :  { %1092 = vmatpush.bf16.msra.mxu2 %v2453_v55  ;;  %v2553_v55 = vor.u32 %v3066_v34, %v2550_v51  ;;  %v3052_v34 = vld [vmem:[#allocation8 + $0x184] sm:$0xf]  ;;  %v2494_v51 = vld [vmem:[#allocation8 + $0x188] sm:$0xf0] }
  0x75   :  { %1106 = vmatpush.bf16.msra.mxu3 %v2517_v56 }
  0x76   :  { %1065 = vmatpush.bf16.msra.mxu0 %v2317_v40  ;;  %v3028_v40 = vld [vmem:[#allocation8 + $0xc4] sm:$0xf] }
  0x77   :  { %1079 = vmatpush.bf16.msra.mxu1 %v2381_v43  ;;  %v2401_v43 = vor.u32 %v3028_v40, %v2398_v42 }
  0x7a   :  { %1066 = vmatpush.bf16.msra.mxu0 %v2309_v44  ;;  %v2444_v44 = vld [vmem:[#allocation8 + $0x120] sm:$0xf] }
  0x7b   :  { %1080 = vmatpush.bf16.msra.mxu1 %v2373_v58  ;;  %v2436_v58 = vld [vmem:[#allocation8 + $0x110] sm:$0xf] }
  0x7c   :  { %v2437_v61 = vor.u32 %v3039_v59, %v2436_v58  ;;  %v3062_v58 = vld [vmem:[#allocation8 + $0x1d4] sm:$0xf]  ;;  %v2534_v59 = vld [vmem:[#allocation8 + $0x1d8] sm:$0xf0] }
  0x7e   :  { %1067 = vmatpush.bf16.msra.mxu0 %v2301_v47  ;;  %v2445_v47 = vor.u32 %v3041_v45, %v2444_v44  ;;  %v3064_v44 = vld [vmem:[#allocation8 + $0x1e4] sm:$0xf]  ;;  %v2542_v45 = vld [vmem:[#allocation8 + $0x1e8] sm:$0xf0] }
  0x7f   :  { %1081 = vmatpush.bf16.msra.mxu1 %v2365_v5  ;;  %v2509_v5 = vor.u32 %v3057_v2, %v2508_v0  ;;  %v2545_v48 = vor.u32 %v3064_v44, %v2542_v45  ;;  %v2454_v0 = vld [vmem:[#allocation8 + $0x138] sm:$0xf0] }
  0x80   :  { %1093 = vmatpush.bf16.msra.mxu2 %v2445_v47 }
  0x81   :  { %1107 = vmatpush.bf16.msra.mxu3 %v2509_v5 }
  0x82   :  { %1116 = vmatpush.bf16.msrb.mxu0 %v2361_v57  ;;  %v2390_v57 = vld [vmem:[#allocation8 + $0xb8] sm:$0xf0] }
  0x83   :  { %1130 = vmatpush.bf16.msrb.mxu1 %v2425_v9  ;;  %v2393_v60 = vor.u32 %v3026_v54, %v2390_v57  ;;  %v3037_v9 = vld [vmem:[#allocation8 + $0x104] sm:$0xf0]  ;;  %v2465_v57 = vor.u32 %v3044_v52, %v2462_v53 }
  0x84   :  { %1094 = vmatpush.bf16.msra.mxu2 %v2437_v61  ;;  %v2429_v11 = vor.u32 %v3037_v9, %v2428_v8  ;;  %v2537_v61 = vor.u32 %v3062_v58, %v2534_v59  ;;  %v2612_v58 = vld [vmem:[#allocation10 + $0x70] sm:$0xf]  ;;  %v3083_v59 = vld [vmem:[#allocation10 + $0x74] sm:$0xf0] }
  0x86   :  { %1117 = vmatpush.bf16.msrb.mxu0 %v2353_v1  ;;  %v2313_v1 = vor.u32 %v3006_v62, %v2310_v63  ;;  %v3042_v63 = vld [vmem:[#allocation8 + $0x134] sm:$0xf] }
  0x87   :  { %1131 = vmatpush.bf16.msrb.mxu1 %v2417_v21  ;;  %v2501_v21 = vor.u32 %v3055_v18, %v2500_v17  ;;  %v2457_v3 = vor.u32 %v3042_v63, %v2454_v0  ;;  %v3038_v18 = vld [vmem:[#allocation8 + $0x114] sm:$0xf]  ;;  %v2604_v63 = vld [vmem:[#allocation10 + $0x60] sm:$0xf]  ;;  %v3081_v0 = vld [vmem:[#allocation10 + $0x64] sm:$0xf0] }
  0x88   :  { %1095 = vmatpush.bf16.msra.mxu2 %v2429_v11  ;;  %v3040_v11 = vld [vmem:[#allocation8 + $0x124] sm:$0xf]  ;;  %v2441_v22 = vor.u32 %v3038_v18, %v2438_v19  ;;  %v2580_v18 = vld [vmem:[#allocation10 + $0x30] sm:$0xf]  ;;  %v3075_v19 = vld [vmem:[#allocation10 + $0x34] sm:$0xf0] }
  0x89   :  { %1108 = vmatpush.bf16.msra.mxu3 %v2501_v21 }
  0x8a   :  { %1118 = vmatpush.bf16.msrb.mxu0 %v2345_v15  ;;  %v2305_v15 = vor.u32 %v3004_v10, %v2302_v12  ;;  %v2446_v12 = vld [vmem:[#allocation8 + $0x128] sm:$0xf0] }
  0x8b   :  { %1132 = vmatpush.bf16.msrb.mxu1 %v2409_v33  ;;  %v2366_v33 = vld [vmem:[#allocation8 + $0x88] sm:$0xf0]  ;;  %v2449_v13 = vor.u32 %v3040_v11, %v2446_v12  ;;  %v2588_v12 = vld [vmem:[#allocation10 + $0x40] sm:$0xf] }
  0x8c   :  { %1144 = vmatpush.bf16.msrb.mxu2 %v2489_v16  ;;  %v2369_v35 = vor.u32 %v3020_v31, %v2366_v33  ;;  %v2518_v16 = vld [vmem:[#allocation8 + $0x1b8] sm:$0xf0] }
  0x8d   :  { %1109 = vmatpush.bf16.msra.mxu3 %v2493_v32  ;;  %v210_v32 = vperm.slane %v3515_v49, 2 }
  0x8e   :  { %1119 = vmatpush.bf16.msrb.mxu0 %v2337_v27 }
  0x8f   :  { %1133 = vmatpush.bf16.msrb.mxu1 %v2401_v43 }
  0x90   :  { %1145 = vmatpush.bf16.msrb.mxu2 %v2481_v28  ;;  %v2502_v28 = vld [vmem:[#allocation8 + $0x198] sm:$0xf0] }
  0x91   :  { %1158 = vmatpush.bf16.msrb.mxu3 %v2553_v55 }
  0x92   :  { %1120 = vmatpush.bf16.msrb.mxu0 %v2329_v37  ;;  %v3046_v37 = vld [vmem:[#allocation8 + $0x154] sm:$0xf] }
  0x93   :  { %1134 = vmatpush.bf16.msrb.mxu1 %v2393_v60  ;;  %v2473_v41 = vor.u32 %v3046_v37, %v2470_v38  ;;  %v211_v37 = vperm.slane %v3515_v49, 3 }
  0x95   :  { %1146 = vmatpush.bf16.msrb.mxu2 %v2473_v41  ;;  %1159 = vmatpush.bf16.msrb.mxu3 %v2545_v48 }
  0x96   :  { %1121 = vmatpush.bf16.msrb.mxu0 %v2321_v50 }
  0x97   :  { %1135 = vmatpush.bf16.msrb.mxu1 %v2385_v6  ;;  %v3060_v6 = vld [vmem:[#allocation8 + $0x1c4] sm:$0xf] }
  0x99   :  { %1147 = vmatpush.bf16.msrb.mxu2 %v2465_v57  ;;  %1160 = vmatpush.bf16.msrb.mxu3 %v2537_v61  ;;  %v2613_v61 = vor.u32 %v3083_v59, %v2612_v58  ;;  %v3093_v58 = vld [vmem:[#allocation10 + $0xc4] sm:$0xf0]  ;;  %v3068_v59 = vld [vmem:[#allocation10 + $0x4] sm:$0xf] }
  0x9a   :  { %1122 = vmatpush.bf16.msrb.mxu0 %v2313_v1 }
  0x9b   :  { %1136 = vmatpush.bf16.msrb.mxu1 %v2377_v24  ;;  %v3036_v24 = vld [vmem:[#allocation8 + $0x104] sm:$0xf] }
  0x9c   :  { %v2433_v29 = vor.u32 %v3036_v24, %v2430_v25  ;;  %v2582_v24 = vld [vmem:[#allocation10 + $0x38] sm:$0xf0] }
  0x9d   :  { %1148 = vmatpush.bf16.msrb.mxu2 %v2457_v3  ;;  %v2606_v3 = vld [vmem:[#allocation10 + $0x68] sm:$0xf0] }
  0x9e   :  { %1123 = vmatpush.bf16.msrb.mxu0 %v2305_v15  ;;  %v3058_v15 = vld [vmem:[#allocation8 + $0x1b4] sm:$0xf] }
  0x9f   :  { %1137 = vmatpush.bf16.msrb.mxu1 %v2369_v35  ;;  %v2521_v17 = vor.u32 %v3058_v15, %v2518_v16  ;;  %v2497_v35 = vor.u32 %v3052_v34, %v2494_v51  ;;  %v2590_v16 = vld [vmem:[#allocation10 + $0x48] sm:$0xf0]  ;;  %v3097_v34 = vld [vmem:[#allocation10 + $0xe4] sm:$0xf0]  ;;  %v3072_v51 = vld [vmem:[#allocation10 + $0x24] sm:$0xf] }
  0xa1   :  { %1149 = vmatpush.bf16.msrb.mxu2 %v2449_v13  ;;  %v3077_v13 = vld [vmem:[#allocation10 + $0x44] sm:$0xf0] }
  0xa2   :  { %v2589_v15 = vor.u32 %v3077_v13, %v2588_v12  ;;  %v2638_v13 = vld [vmem:[#allocation10 + $0xa8] sm:$0xf0] }
  0xa5   :  { %1150 = vmatpush.bf16.msrb.mxu2 %v2441_v22  ;;  %v3099_v22 = vld [vmem:[#allocation10 + $0xf4] sm:$0xf0] }
  0xa9   :  { %1151 = vmatpush.bf16.msrb.mxu2 %v2433_v29 }
  0xbe   :  { %v555_v20 = vpop.f32.mrf.mxu0 }
  0xbf   :  { %v569_v23 = vpop.f32.mrf.mxu1  ;;  %v556_v27 = vadd.f32 %v555_v20, %v208_v7  ;;  %v3056_v20 = vld [vmem:[#allocation8 + $0x1a4] sm:$0xf] }
  0xc1   :  { %v570_v39 = vadd.f32 %v569_v23, %v556_v27  ;;  %v2510_v23 = vld [vmem:[#allocation8 + $0x1a8] sm:$0xf0]  ;;  %v3054_v27 = vld [vmem:[#allocation8 + $0x194] sm:$0xf] }
  0xc2   :  { %v2513_v26 = vor.u32 %v3056_v20, %v2510_v23  ;;  %v2505_v30 = vor.u32 %v3054_v27, %v2502_v28  ;;  %v2676_v20 = vld [vmem:[#allocation10 + $0xf0] sm:$0xf]  ;;  %v3074_v23 = vld [vmem:[#allocation10 + $0x34] sm:$0xf]  ;;  %v2678_v28 = vld [vmem:[#allocation10 + $0xf8] sm:$0xf0] }
  0xc3   :  { %v658_v54 = vmax.f32 %v570_v39, 0.0  ;;  %v2677_v25 = vor.u32 %v3099_v22, %v2676_v20  ;;  %v3098_v27 = vld [vmem:[#allocation10 + $0xf4] sm:$0xf]  ;;  %v2630_v20 = vld [vmem:[#allocation10 + $0x98] sm:$0xf0] }
  0xc4   :  { %v2681_v29 = vor.u32 %v3098_v27, %v2678_v28 }
  0xc6   :  { %v583_v40 = vpop.f32.mrf.mxu2  ;;  %v557_v42 = vpop.f32.mrf.mxu0 }
  0xc7   :  { %v597_v43 = vpop.f32.mrf.mxu3  ;;  %v558_v46 = vadd.f32 %v557_v42, %v208_v7  ;;  %v571_v47 = vpop.f32.mrf.mxu1  ;;  %v584_v50 = vadd.f32 %v583_v40, %v209_v36  ;;  %v2526_v7 = vld [vmem:[#allocation8 + $0x1c8] sm:$0xf0] }
  0xc8   :  { %v2529_v8 = vor.u32 %v3060_v6, %v2526_v7  ;;  %v2596_v6 = vld [vmem:[#allocation10 + $0x50] sm:$0xf]  ;;  %v3079_v7 = vld [vmem:[#allocation10 + $0x54] sm:$0xf0] }
  0xc9   :  { %v572_v56 = vadd.f32 %v571_v47, %v558_v46  ;;  %v598_v62 = vadd.f32 %v597_v43, %v584_v50 }
  0xca   :  { %1161 = vmatpush.bf16.msrb.mxu3 %v2529_v8  ;;  %v3078_v8 = vld [vmem:[#allocation10 + $0x54] sm:$0xf] }
  0xcb   :  { %v662_v60 = vmax.f32 %v572_v56, 0.0  ;;  %v659_v9 = vmax.f32 %v598_v62, 0.0  ;;  %v2614_v62 = vld [vmem:[#allocation10 + $0x78] sm:$0xf0] }
  0xcd   :  { %v666_v1 = vpack.c.bf16 %v662_v60, %v658_v54  ;;  %v3082_v60 = vld [vmem:[#allocation10 + $0x74] sm:$0xf] }
  0xce   :  { %v585_v2 = vpop.f32.mrf.mxu2  ;;  %1162 = vmatpush.bf16.msrb.mxu3 %v2521_v17 }
  0xcf   :  { %v586_v4 = vadd.f32 %v585_v2, %v209_v36  ;;  %v599_v5 = vpop.f32.mrf.mxu3  ;;  %1068 = vmatmul.bf16.vlgmr.msra.gmra.mxu0 %v666_v1  ;;  %v3080_v2 = vld [vmem:[#allocation10 + $0x64] sm:$0xf] }
  0xd0   :  { %1376 = vmatpush.bf16.msra.mxu0 %v2613_v61 }
  0xd1   :  { %v600_v10 = vadd.f32 %v599_v5, %v586_v4  ;;  %v2605_v4 = vor.u32 %v3081_v0, %v2604_v63  ;;  %v2609_v5 = vor.u32 %v3080_v2, %v2606_v3  ;;  %v3092_v63 = vld [vmem:[#allocation10 + $0xc4] sm:$0xf]  ;;  %v2654_v0 = vld [vmem:[#allocation10 + $0xc8] sm:$0xf0]  ;;  %v2644_v2 = vld [vmem:[#allocation10 + $0xb0] sm:$0xf] }
  0xd2   :  { %1163 = vmatpush.bf16.msrb.mxu3 %v2513_v26  ;;  %v2585_v26 = vor.u32 %v3074_v23, %v2582_v24  ;;  %v3091_v3 = vld [vmem:[#allocation10 + $0xb4] sm:$0xf0]  ;;  %v2620_v24 = vld [vmem:[#allocation10 + $0x80] sm:$0xf] }
  0xd3   :  { %v663_v14 = vmax.f32 %v600_v10, 0.0  ;;  %v2598_v10 = vld [vmem:[#allocation10 + $0x58] sm:$0xf0] }
  0xd4   :  { %1377 = vmatpush.bf16.msra.mxu0 %v2605_v4  ;;  %v2601_v11 = vor.u32 %v3078_v8, %v2598_v10  ;;  %v3090_v4 = vld [vmem:[#allocation10 + $0xb4] sm:$0xf]  ;;  %v3089_v10 = vld [vmem:[#allocation10 + $0xa4] sm:$0xf0] }
  0xd5   :  { %v667_v21 = vpack.c.bf16 %v663_v14, %v659_v9  ;;  %v2597_v9 = vor.u32 %v3079_v7, %v2596_v6  ;;  %v3076_v14 = vld [vmem:[#allocation10 + $0x44] sm:$0xf]  ;;  %v2646_v6 = vld [vmem:[#allocation10 + $0xb8] sm:$0xf0] }
  0xd6   :  { %1164 = vmatpush.bf16.msrb.mxu3 %v2505_v30  ;;  %v2593_v17 = vor.u32 %v3076_v14, %v2590_v16  ;;  %v2572_v30 = vld [vmem:[#allocation10 + $0x20] sm:$0xf]  ;;  %v2649_v7 = vor.u32 %v3090_v4, %v2646_v6  ;;  %v2628_v16 = vld [vmem:[#allocation10 + $0x90] sm:$0xf]  ;;  %v3147_v4 = vld [vmem:[#allocation13 + $0x74] sm:$0xf0] }
  0xd7   :  { %1082 = vmatmul.bf16.vlgmr.msra.gmra.mxu1 %v667_v21 }
  0xd8   :  { %1378 = vmatpush.bf16.msra.mxu0 %v2597_v9  ;;  %1390 = vmatpush.bf16.msra.mxu1 %v2677_v25  ;;  %v2636_v9 = vld [vmem:[#allocation10 + $0xa0] sm:$0xf]  ;;  %v3085_v25 = vld [vmem:[#allocation10 + $0x84] sm:$0xf0] }
  0xd9   :  { %v2637_v12 = vor.u32 %v3089_v10, %v2636_v9  ;;  %v2621_v28 = vor.u32 %v3085_v25, %v2620_v24  ;;  %v2732_v9 = vld [vmem:[#allocation13 + $0x60] sm:$0xf]  ;;  %v3145_v10 = vld [vmem:[#allocation13 + $0x64] sm:$0xf0]  ;;  %v2726_v25 = vld [vmem:[#allocation13 + $0x58] sm:$0xf0] }
  0xda   :  { %1165 = vmatpush.bf16.msrb.mxu3 %v2497_v35  ;;  %v2574_v35 = vld [vmem:[#allocation10 + $0x28] sm:$0xf0] }
  0xdc   :  { %1379 = vmatpush.bf16.msra.mxu0 %v2589_v15 }
  0xde   :  { %v611_v31 = vpop.f32.mrf.mxu0 }
  0xdf   :  { %v625_v33 = vpop.f32.mrf.mxu1  ;;  %1124 = vmatmul.bf16.vlgmr.msrb.gmra.mxu0 %v666_v1  ;;  %v612_v55 = vadd.f32 %v611_v31, %v210_v32  ;;  %v2617_v1 = vor.u32 %v3082_v60, %v2614_v62  ;;  %v3073_v31 = vld [vmem:[#allocation10 + $0x24] sm:$0xf0]  ;;  %v2558_v60 = vld [vmem:[#allocation10 + $0x8] sm:$0xf0] }
  0xe0   :  { %v2561_v62 = vor.u32 %v3068_v59, %v2558_v60 }
  0xe1   :  { %v626_v40 = vadd.f32 %v625_v33, %v612_v55  ;;  %v2573_v33 = vor.u32 %v3073_v31, %v2572_v30 }
  0xe3   :  { %v660_v45 = vmax.f32 %v626_v40, 0.0  ;;  %v2564_v40 = vld [vmem:[#allocation10 + $0x10] sm:$0xf] }
  0xe6   :  { %v639_v36 = vpop.f32.mrf.mxu2  ;;  %v613_v39 = vpop.f32.mrf.mxu0 }
  0xe7   :  { %v653_v38 = vpop.f32.mrf.mxu3  ;;  %v614_v41 = vadd.f32 %v613_v39, %v210_v32  ;;  %v627_v42 = vpop.f32.mrf.mxu1  ;;  %1138 = vmatmul.bf16.vlgmr.msrb.gmra.mxu1 %v667_v21  ;;  %v640_v44 = vadd.f32 %v639_v36, %v211_v37  ;;  %v2581_v21 = vor.u32 %v3075_v19, %v2580_v18  ;;  %v2668_v32 = vld [vmem:[#allocation10 + $0xe0] sm:$0xf]  ;;  %v2577_v36 = vor.u32 %v3072_v51, %v2574_v35  ;;  %v3086_v18 = vld [vmem:[#allocation10 + $0x94] sm:$0xf] }
  0xe8   :  { %v2669_v55 = vor.u32 %v3097_v34, %v2668_v32  ;;  %v2633_v22 = vor.u32 %v3086_v18, %v2630_v20 }
  0xe9   :  { %v628_v43 = vadd.f32 %v627_v42, %v614_v41  ;;  %v654_v50 = vadd.f32 %v653_v38, %v640_v44  ;;  %1380 = vmatpush.bf16.msra.mxu0 %v2581_v21  ;;  %v2670_v38 = vld [vmem:[#allocation10 + $0xe8] sm:$0xf0]  ;;  %v3071_v41 = vld [vmem:[#allocation10 + $0x14] sm:$0xf0]  ;;  %v2660_v42 = vld [vmem:[#allocation10 + $0xd0] sm:$0xf] }
  0xea   :  { %1391 = vmatpush.bf16.msra.mxu1 %v2669_v55  ;;  %v3095_v44 = vld [vmem:[#allocation10 + $0xd4] sm:$0xf0]  ;;  %v734_v21 = vld [vmem:[%s3581_s4] sm:$0x3] }
  0xeb   :  { %v664_v46 = vmax.f32 %v628_v43, 0.0  ;;  %v661_v56 = vmax.f32 %v654_v50, 0.0  ;;  %v2565_v43 = vor.u32 %v3071_v41, %v2564_v40  ;;  %v3094_v50 = vld [vmem:[#allocation10 + $0xd4] sm:$0xf]  ;;  %v736_v27 = vperm.slane %v734_v21, 0 }
  0xed   :  { %v668_v47 = vpack.c.bf16 %v664_v46, %v660_v45  ;;  %1381 = vmatpush.bf16.msra.mxu0 %v2573_v33  ;;  %v3070_v45 = vld [vmem:[#allocation10 + $0x14] sm:$0xf]  ;;  %v2566_v46 = vld [vmem:[#allocation10 + $0x18] sm:$0xf0] }
  0xee   :  { %v641_v48 = vpop.f32.mrf.mxu2 }
  0xef   :  { %v642_v52 = vadd.f32 %v641_v48, %v211_v37  ;;  %v655_v53 = vpop.f32.mrf.mxu3  ;;  %1096 = vmatmul.bf16.vlgmr.msra.gmra.mxu2 %v668_v47  ;;  %v3096_v37 = vld [vmem:[#allocation10 + $0xe4] sm:$0xf]  ;;  %v2569_v48 = vor.u32 %v3070_v45, %v2566_v46 }
  0xf0   :  { %1404 = vmatpush.bf16.msra.mxu2 %v2617_v1  ;;  %v2673_v39 = vor.u32 %v3096_v37, %v2670_v38  ;;  %v2657_v1 = vor.u32 %v3092_v63, %v2654_v0 }
  0xf1   :  { %v656_v54 = vadd.f32 %v655_v53, %v642_v52  ;;  %v2662_v52 = vld [vmem:[#allocation10 + $0xd8] sm:$0xf0]  ;;  %1382 = vmatpush.bf16.msra.mxu0 %v2565_v43 }
  0xf2   :  { %v2665_v53 = vor.u32 %v3094_v50, %v2662_v52 }
  0xf3   :  { %v665_v57 = vmax.f32 %v656_v54, 0.0  ;;  %v2556_v54 = vld [vmem:[#allocation10] sm:$0xf] }
  0xf4   :  { %1405 = vmatpush.bf16.msra.mxu2 %v2609_v5  ;;  %v2645_v5 = vor.u32 %v3091_v3, %v2644_v2  ;;  %v2740_v3 = vld [vmem:[#allocation13 + $0x70] sm:$0xf] }
  0xf5   :  { %v669_v49 = vpack.c.bf16 %v665_v57, %v661_v56  ;;  %v3069_v56 = vld [vmem:[#allocation10 + $0x4] sm:$0xf0]  ;;  %v2652_v57 = vld [vmem:[#allocation10 + $0xc0] sm:$0xf]  ;;  %v2741_v6 = vor.u32 %v3147_v4, %v2740_v3  ;;  %v2774_v3 = vld [vmem:[#allocation13 + $0xb8] sm:$0xf0] }
  0xf6   :  { %v2653_v61 = vor.u32 %v3093_v58, %v2652_v57 }
  0xf7   :  { %1110 = vmatmul.bf16.vlgmr.msra.gmra.mxu3 %v669_v49 }
  0xf8   :  { %1406 = vmatpush.bf16.msra.mxu2 %v2601_v11  ;;  %1418 = vmatpush.bf16.msra.mxu3 %v2681_v29  ;;  %v3088_v11 = vld [vmem:[#allocation10 + $0xa4] sm:$0xf]  ;;  %v2622_v29 = vld [vmem:[#allocation10 + $0x88] sm:$0xf0] }
  0xf9   :  { %v2641_v15 = vor.u32 %v3088_v11, %v2638_v13  ;;  %v3144_v11 = vld [vmem:[#allocation13 + $0x64] sm:$0xf]  ;;  %v2734_v13 = vld [vmem:[#allocation13 + $0x68] sm:$0xf0] }
  0xfc   :  { %1407 = vmatpush.bf16.msra.mxu2 %v2593_v17  ;;  %1419 = vmatpush.bf16.msra.mxu3 %v2673_v39  ;;  %v3087_v17 = vld [vmem:[#allocation10 + $0x94] sm:$0xf0] }
  0xfd   :  { %v2629_v19 = vor.u32 %v3087_v17, %v2628_v16  ;;  %v3163_v16 = vld [vmem:[#allocation13 + $0xf4] sm:$0xf0]  ;;  %v3162_v17 = vld [vmem:[#allocation13 + $0xf4] sm:$0xf] }
  0xff   :  { %1152 = vmatmul.bf16.vlgmr.msrb.gmra.mxu2 %v668_v47  ;;  %v2661_v47 = vor.u32 %v3095_v44, %v2660_v42 }
 0x100   :  { %1408 = vmatpush.bf16.msra.mxu2 %v2585_v26  ;;  %1420 = vmatpush.bf16.msra.mxu3 %v2665_v53  ;;  %v3084_v26 = vld [vmem:[#allocation10 + $0x84] sm:$0xf] }
 0x101   :  { %1392 = vmatpush.bf16.msra.mxu1 %v2661_v47  ;;  %v2625_v31 = vor.u32 %v3084_v26, %v2622_v29  ;;  %v737_v47 = vperm.slane %v734_v21, 1  ;;  %v2724_v21 = vld [vmem:[#allocation13 + $0x50] sm:$0xf]  ;;  %v3160_v29 = vld [vmem:[#allocation13 + $0xe4] sm:$0xf] }
 0x104   :  { %1409 = vmatpush.bf16.msra.mxu2 %v2577_v36  ;;  %1421 = vmatpush.bf16.msra.mxu3 %v2657_v1 }
 0x105   :  { %1393 = vmatpush.bf16.msra.mxu1 %v2653_v61 }
 0x107   :  { %1166 = vmatmul.bf16.vlgmr.msrb.gmra.mxu3 %v669_v49  ;;  %v2557_v49 = vor.u32 %v3069_v56, %v2556_v54 }
 0x108   :  { %1410 = vmatpush.bf16.msra.mxu2 %v2569_v48  ;;  %1422 = vmatpush.bf16.msra.mxu3 %v2649_v7  ;;  %v2742_v7 = vld [vmem:[#allocation13 + $0x78] sm:$0xf0] }
 0x109   :  { %1383 = vmatpush.bf16.msra.mxu0 %v2557_v49  ;;  %1394 = vmatpush.bf16.msra.mxu1 %v2645_v5  ;;  %v3146_v5 = vld [vmem:[#allocation13 + $0x74] sm:$0xf] }
 0x10c   :  { %1411 = vmatpush.bf16.msra.mxu2 %v2561_v62  ;;  %1423 = vmatpush.bf16.msra.mxu3 %v2641_v15  ;;  %v2804_v15 = vld [vmem:[#allocation13 + $0xf0] sm:$0xf] }
 0x10d   :  { %1395 = vmatpush.bf16.msra.mxu1 %v2637_v12  ;;  %1720 = vmatpush.bf16.msrb.mxu0 %v2741_v6  ;;  %v2733_v12 = vor.u32 %v3145_v10, %v2732_v9  ;;  %v2805_v18 = vor.u32 %v3163_v16, %v2804_v15  ;;  %v3135_v6 = vld [vmem:[#allocation13 + $0x14] sm:$0xf0]  ;;  %v2694_v9 = vld [vmem:[#allocation13 + $0x18] sm:$0xf0]  ;;  %v2766_v16 = vld [vmem:[#allocation13 + $0xa8] sm:$0xf0] }
 0x110   :  { %1424 = vmatpush.bf16.msra.mxu3 %v2633_v22  ;;  %v3143_v22 = vld [vmem:[#allocation13 + $0x54] sm:$0xf0] }
 0x111   :  { %1396 = vmatpush.bf16.msra.mxu1 %v2629_v19  ;;  %1721 = vmatpush.bf16.msrb.mxu0 %v2733_v12  ;;  %v2806_v19 = vld [vmem:[#allocation13 + $0xf8] sm:$0xf0]  ;;  %v2725_v24 = vor.u32 %v3143_v22, %v2724_v21  ;;  %v3153_v12 = vld [vmem:[#allocation13 + $0xa4] sm:$0xf0]  ;;  %v2686_v22 = vld [vmem:[#allocation13 + $0x8] sm:$0xf0] }
 0x112   :  { %v2809_v20 = vor.u32 %v3162_v17, %v2806_v19  ;;  %v3133_v19 = vld [vmem:[#allocation13 + $0x4] sm:$0xf0] }
 0x114   :  { %1425 = vmatpush.bf16.msra.mxu3 %v2625_v31  ;;  %v2798_v31 = vld [vmem:[#allocation13 + $0xe8] sm:$0xf0] }
 0x115   :  { %1397 = vmatpush.bf16.msra.mxu1 %v2621_v28  ;;  %v3161_v28 = vld [vmem:[#allocation13 + $0xe4] sm:$0xf0]  ;;  %1722 = vmatpush.bf16.msrb.mxu0 %v2725_v24  ;;  %v3115_v24 = vld [vmem:[#allocation11 + $0x74] sm:$0xf0] }
 0x118   :  { %1762 = vmatpush.bf16.msrb.mxu3 %v2809_v20  ;;  %v3132_v20 = vld [vmem:[#allocation13 + $0x4] sm:$0xf] }
 0x119   :  { %1734 = vmatpush.bf16.msrb.mxu1 %v2805_v18  ;;  %v2684_v18 = vld [vmem:[#allocation13] sm:$0xf] }
 0x11a   :  { %v2685_v21 = vor.u32 %v3133_v19, %v2684_v18 }
 0x14c   :  { %v1069_v8 = vpop.f32.mrf.mxu0 }
 0x14d   :  { %v1070_v33 = vadd.f32 %v1069_v8, %v736_v27  ;;  %v2745_v8 = vor.u32 %v3146_v5, %v2742_v7  ;;  %v2692_v5 = vld [vmem:[#allocation13 + $0x10] sm:$0xf]  ;;  %v3134_v7 = vld [vmem:[#allocation13 + $0x14] sm:$0xf] }
 0x14e   :  { %v2697_v10 = vor.u32 %v3134_v7, %v2694_v9  ;;  %v2926_v7 = vld [vmem:[#allocation11 + $0xe8] sm:$0xf0] }
 0x14f   :  { %1748 = vmatpush.bf16.msrb.mxu2 %v2745_v8  ;;  %v2693_v8 = vor.u32 %v3135_v6, %v2692_v5  ;;  %v3128_v5 = vld [vmem:[#allocation11 + $0xe4] sm:$0xf] }
 0x150   :  { %v2929_v9 = vor.u32 %v3128_v5, %v2926_v7 }
 0x154   :  { %v1083_v14 = vpop.f32.mrf.mxu1  ;;  %v1071_v30 = vpop.f32.mrf.mxu0 }
 0x155   :  { %v1084_v35 = vadd.f32 %v1083_v14, %v1070_v33  ;;  %v1072_v55 = vadd.f32 %v1071_v30, %v736_v27  ;;  %v2737_v14 = vor.u32 %v3144_v11, %v2734_v13  ;;  %v2796_v27 = vld [vmem:[#allocation13 + $0xe0] sm:$0xf]  ;;  %v3152_v13 = vld [vmem:[#allocation13 + $0xa4] sm:$0xf] }
 0x156   :  { %v2797_v30 = vor.u32 %v3161_v28, %v2796_v27  ;;  %v2716_v33 = vld [vmem:[#allocation13 + $0x40] sm:$0xf]  ;;  %v2769_v17 = vor.u32 %v3152_v13, %v2766_v16  ;;  %v3114_v27 = vld [vmem:[#allocation11 + $0x74] sm:$0xf]  ;;  %v2870_v28 = vld [vmem:[#allocation11 + $0x78] sm:$0xf0] }
 0x157   :  { %1749 = vmatpush.bf16.msrb.mxu2 %v2737_v14  ;;  %v2764_v11 = vld [vmem:[#allocation13 + $0xa0] sm:$0xf]  ;;  %v3527_v14 = vld [vmem:[%s3583_s6] sm:$0x3]  ;;  %v3108_v13 = vld [vmem:[#allocation11 + $0x44] sm:$0xf] }
 0x158   :  { %1735 = vmatpush.bf16.msrb.mxu1 %v2797_v30  ;;  %v2765_v15 = vor.u32 %v3153_v12, %v2764_v11  ;;  %v2873_v30 = vor.u32 %v3114_v27, %v2870_v28  ;;  %v3109_v12 = vld [vmem:[#allocation11 + $0x44] sm:$0xf0]  ;;  %s3413_s6 = smov [#allocation14]  }
 0x159   :  { %s2016_s24 = sshll.u32 %s3413_s6, 4  ;;  %s2017_s24 = int_to_ptr.vmem [resolvable:$true] %s2016_s24 }
 0x15c   :  { %v1085_v32 = vpop.f32.mrf.mxu1  ;;  %v1125_v38 = vpop.f32.mrf.mxu0 }
 0x15d   :  { %v1086_v36 = vadd.f32 %v1085_v32, %v1072_v55  ;;  %v1126_v53 = vadd.f32 %v1125_v38, %v737_v47  ;;  %v2801_v32 = vor.u32 %v3160_v29, %v2798_v31  ;;  %v2718_v55 = vld [vmem:[#allocation13 + $0x48] sm:$0xf0]  ;;  %v3159_v38 = vld [vmem:[#allocation13 + $0xd4] sm:$0xf0]  ;;  %v2756_v29 = vld [vmem:[#allocation13 + $0x90] sm:$0xf] }
 0x15e   :  { %v3151_v31 = vld [vmem:[#allocation13 + $0x94] sm:$0xf0] }
 0x15f   :  { %1763 = vmatpush.bf16.msrb.mxu3 %v2801_v32  ;;  %v3150_v32 = vld [vmem:[#allocation13 + $0x94] sm:$0xf] }
 0x164   :  { %v1139_v41 = vpop.f32.mrf.mxu1  ;;  %v1127_v50 = vpop.f32.mrf.mxu0 }
 0x165   :  { %v1140_v56 = vadd.f32 %v1139_v41, %v1126_v53  ;;  %v1128_v57 = vadd.f32 %v1127_v50, %v737_v47  ;;  %v2790_v41 = vld [vmem:[#allocation13 + $0xd8] sm:$0xf0]  ;;  %v2780_v50 = vld [vmem:[#allocation13 + $0xc0] sm:$0xf]  ;;  %v3156_v53 = vld [vmem:[#allocation13 + $0xc4] sm:$0xf] }
 0x166   :  { %v2710_v47 = vld [vmem:[#allocation13 + $0x38] sm:$0xf0] }
 0x16c   :  { %v1141_v54 = vpop.f32.mrf.mxu1 }
 0x16d   :  { %v1142_v58 = vadd.f32 %v1141_v54, %v1128_v57 }
 0x172   :  { %v1097_v23 = vpop.f32.mrf.mxu2 }
 0x173   :  { %v1098_v37 = vadd.f32 %v1097_v23, %v1084_v35  ;;  %v3142_v23 = vld [vmem:[#allocation13 + $0x54] sm:$0xf] }
 0x174   :  { %v2729_v26 = vor.u32 %v3142_v23, %v2726_v25  ;;  %v2868_v23 = vld [vmem:[#allocation11 + $0x70] sm:$0xf]  ;;  %v2689_v25 = vor.u32 %v3132_v20, %v2686_v22 }
 0x175   :  { %v2916_v20 = vld [vmem:[#allocation11 + $0xd0] sm:$0xf] }
 0x176   :  { %1750 = vmatpush.bf16.msrb.mxu2 %v2729_v26  ;;  %v2869_v26 = vor.u32 %v3115_v24, %v2868_v23  ;;  %v3126_v24 = vld [vmem:[#allocation11 + $0xd4] sm:$0xf] }
 0x17a   :  { %v1111_v34 = vpop.f32.mrf.mxu3  ;;  %v1099_v51 = vpop.f32.mrf.mxu2 }
 0x17b   :  { %v1112_v39 = vadd.f32 %v1111_v34, %v1098_v37  ;;  %v1100_v40 = vadd.f32 %v1099_v51, %v1086_v36  ;;  %v3141_v34 = vld [vmem:[#allocation13 + $0x44] sm:$0xf0]  ;;  %v3140_v51 = vld [vmem:[#allocation13 + $0x44] sm:$0xf]  ;;  %v2788_v37 = vld [vmem:[#allocation13 + $0xd0] sm:$0xf] }
 0x17c   :  { %v2717_v35 = vor.u32 %v3141_v34, %v2716_v33  ;;  %v2721_v36 = vor.u32 %v3140_v51, %v2718_v55  ;;  %v2758_v33 = vld [vmem:[#allocation13 + $0x98] sm:$0xf0]  ;;  %v1212_v34 = vperm.slane %v3527_v14, 0 }
 0x17d   :  { %v1172_v45 = vmax.f32 %v1112_v39, 0.0  ;;  %v3158_v39 = vld [vmem:[#allocation13 + $0xd4] sm:$0xf]  ;;  %v2761_v55 = vor.u32 %v3150_v32, %v2758_v33 }
 0x17e   :  { %1723 = vmatpush.bf16.msrb.mxu0 %v2717_v35  ;;  %1751 = vmatpush.bf16.msrb.mxu2 %v2721_v36  ;;  %v2757_v35 = vor.u32 %v3151_v31, %v2756_v29  ;;  %v2860_v36 = vld [vmem:[#allocation11 + $0x60] sm:$0xf]  ;;  %v3107_v31 = vld [vmem:[#allocation11 + $0x34] sm:$0xf0] }
 0x182   :  { %v1113_v42 = vpop.f32.mrf.mxu3  ;;  %v1153_v44 = vpop.f32.mrf.mxu2 }
 0x183   :  { %v1114_v43 = vadd.f32 %v1113_v42, %v1100_v40  ;;  %v1154_v59 = vadd.f32 %v1153_v44, %v1140_v56  ;;  %v2789_v40 = vor.u32 %v3159_v38, %v2788_v37  ;;  %v2793_v42 = vor.u32 %v3158_v39, %v2790_v41  ;;  %v3139_v44 = vld [vmem:[#allocation13 + $0x34] sm:$0xf0]  ;;  %v2782_v56 = vld [vmem:[#allocation13 + $0xc8] sm:$0xf0]  ;;  %v3113_v37 = vld [vmem:[#allocation11 + $0x64] sm:$0xf0] }
 0x184   :  { %v2785_v57 = vor.u32 %v3156_v53, %v2782_v56  ;;  %v3112_v38 = vld [vmem:[#allocation11 + $0x64] sm:$0xf]  ;;  %v2861_v39 = vor.u32 %v3113_v37, %v2860_v36  ;;  %v2748_v41 = vld [vmem:[#allocation13 + $0x80] sm:$0xf]  ;;  %v2934_v53 = vld [vmem:[#allocation11 + $0xf8] sm:$0xf0] }
 0x185   :  { %v1174_v46 = vmax.f32 %v1114_v43, 0.0  ;;  %v2708_v43 = vld [vmem:[#allocation13 + $0x30] sm:$0xf]  ;;  %1736 = vmatpush.bf16.msrb.mxu1 %v2789_v40  ;;  %1764 = vmatpush.bf16.msrb.mxu3 %v2793_v42  ;;  %v2862_v40 = vld [vmem:[#allocation11 + $0x68] sm:$0xf0] }
 0x186   :  { %v3149_v42 = vld [vmem:[#allocation13 + $0x84] sm:$0xf0] }
 0x187   :  { %v1176_v48 = vpack.c.bf16 %v1174_v46, %v1172_v45  ;;  %v3138_v45 = vld [vmem:[#allocation13 + $0x34] sm:$0xf]  ;;  %v2709_v46 = vor.u32 %v3139_v44, %v2708_v43  ;;  %v2865_v43 = vor.u32 %v3112_v38, %v2862_v40  ;;  %v2749_v44 = vor.u32 %v3149_v42, %v2748_v41  ;;  %v3124_v40 = vld [vmem:[#allocation11 + $0xc4] sm:$0xf]  ;;  %v2910_v41 = vld [vmem:[#allocation11 + $0xc8] sm:$0xf0] }
 0x189   :  { %1384 = vmatmul.bf16.vlgmr.msra.gmra.mxu0 %v1176_v48  ;;  %1412 = vmatmul.bf16.vlgmr.msra.gmra.mxu2 %v1176_v48  ;;  %v2713_v48 = vor.u32 %v3138_v45, %v2710_v47  ;;  %v3148_v45 = vld [vmem:[#allocation13 + $0x84] sm:$0xf]  ;;  %v2932_v47 = vld [vmem:[#allocation11 + $0xf0] sm:$0xf] }
 0x18a   :  { %v1167_v52 = vpop.f32.mrf.mxu3  ;;  %v1155_v49 = vpop.f32.mrf.mxu2  ;;  %1724 = vmatpush.bf16.msrb.mxu0 %v2709_v46  ;;  %1765 = vmatpush.bf16.msrb.mxu3 %v2785_v57  ;;  %v2750_v46 = vld [vmem:[#allocation13 + $0x88] sm:$0xf0] }
 0x18b   :  { %v1168_v60 = vadd.f32 %v1167_v52, %v1154_v59  ;;  %v1156_v61 = vadd.f32 %v1155_v49, %v1142_v58  ;;  %v3157_v52 = vld [vmem:[#allocation13 + $0xc4] sm:$0xf0]  ;;  %1752 = vmatpush.bf16.msrb.mxu2 %v2713_v48  ;;  %v2700_v49 = vld [vmem:[#allocation13 + $0x20] sm:$0xf]  ;;  %v3136_v59 = vld [vmem:[#allocation13 + $0x24] sm:$0xf]  ;;  %v2753_v48 = vor.u32 %v3148_v45, %v2750_v46 }
 0x18c   :  { %v2781_v54 = vor.u32 %v3157_v52, %v2780_v50  ;;  %v3137_v58 = vld [vmem:[#allocation13 + $0x24] sm:$0xf0]  ;;  %v3131_v50 = vld [vmem:[#allocation11 + $0xf4] sm:$0xf0]  ;;  %v3130_v52 = vld [vmem:[#allocation11 + $0xf4] sm:$0xf] }
 0x18d   :  { %v1173_v0 = vmax.f32 %v1168_v60, 0.0  ;;  %v2701_v60 = vor.u32 %v3137_v58, %v2700_v49  ;;  %v2933_v57 = vor.u32 %v3131_v50, %v2932_v47  ;;  %v2937_v49 = vor.u32 %v3130_v52, %v2934_v53  ;;  %v2852_v58 = vld [vmem:[#allocation11 + $0x50] sm:$0xf]  ;;  %v3104_v50 = vld [vmem:[#allocation11 + $0x24] sm:$0xf] }
 0x18e   :  { %1737 = vmatpush.bf16.msrb.mxu1 %v2781_v54  ;;  %v2913_v47 = vor.u32 %v3124_v40, %v2910_v41  ;;  %v2830_v52 = vld [vmem:[#allocation11 + $0x28] sm:$0xf0]  ;;  %v3117_v40 = vld [vmem:[#allocation11 + $0x84] sm:$0xf0]  ;;  %v3116_v41 = vld [vmem:[#allocation11 + $0x84] sm:$0xf] }
 0x18f   :  { %1725 = vmatpush.bf16.msrb.mxu0 %v2701_v60  ;;  %v3110_v60 = vld [vmem:[#allocation11 + $0x54] sm:$0xf] }
 0x192   :  { %v1169_v62 = vpop.f32.mrf.mxu3 }
 0x193   :  { %v1170_v63 = vadd.f32 %v1169_v62, %v1156_v61  ;;  %v2702_v61 = vld [vmem:[#allocation13 + $0x28] sm:$0xf0]  ;;  %1726 = vmatpush.bf16.msrb.mxu0 %v2693_v8 }
 0x194   :  { %v2705_v62 = vor.u32 %v3136_v59, %v2702_v61  ;;  %v3111_v59 = vld [vmem:[#allocation11 + $0x54] sm:$0xf0]  ;;  %v1213_v61 = vperm.slane %v3527_v14, 1 }
 0x195   :  { %v1175_v1 = vmax.f32 %v1170_v63, 0.0  ;;  %v2772_v63 = vld [vmem:[#allocation13 + $0xb0] sm:$0xf] }
 0x196   :  { %1753 = vmatpush.bf16.msrb.mxu2 %v2705_v62 }
 0x197   :  { %v1177_v2 = vpack.c.bf16 %v1175_v1, %v1173_v0  ;;  %v3155_v0 = vld [vmem:[#allocation13 + $0xb4] sm:$0xf0]  ;;  %v3154_v1 = vld [vmem:[#allocation13 + $0xb4] sm:$0xf]  ;;  %1727 = vmatpush.bf16.msrb.mxu0 %v2685_v21 }
 0x198   :  { %v2777_v4 = vor.u32 %v3154_v1, %v2774_v3  ;;  %v2924_v3 = vld [vmem:[#allocation11 + $0xe0] sm:$0xf]  ;;  %v3127_v21 = vld [vmem:[#allocation11 + $0xd4] sm:$0xf0] }
 0x199   :  { %1398 = vmatmul.bf16.vlgmr.msra.gmra.mxu1 %v1177_v2  ;;  %1426 = vmatmul.bf16.vlgmr.msra.gmra.mxu3 %v1177_v2  ;;  %v2773_v2 = vor.u32 %v3155_v0, %v2772_v63  ;;  %v2853_v63 = vor.u32 %v3111_v59, %v2852_v58  ;;  %v2854_v0 = vld [vmem:[#allocation11 + $0x58] sm:$0xf0]  ;;  %v2917_v23 = vor.u32 %v3127_v21, %v2916_v20  ;;  %v3123_v59 = vld [vmem:[#allocation11 + $0xb4] sm:$0xf0] }
 0x19a   :  { %1766 = vmatpush.bf16.msrb.mxu3 %v2777_v4  ;;  %1754 = vmatpush.bf16.msrb.mxu2 %v2697_v10  ;;  %v3129_v4 = vld [vmem:[#allocation11 + $0xe4] sm:$0xf0]  ;;  %v2844_v10 = vld [vmem:[#allocation11 + $0x40] sm:$0xf] }
 0x19b   :  { %1738 = vmatpush.bf16.msrb.mxu1 %v2773_v2  ;;  %1936 = vmatpush.bf16.msra.mxu0 %v2869_v26  ;;  %v2857_v2 = vor.u32 %v3110_v60, %v2854_v0  ;;  %v2925_v6 = vor.u32 %v3129_v4, %v2924_v3  ;;  %v2845_v18 = vor.u32 %v3109_v12, %v2844_v10  ;;  %v3122_v60 = vld [vmem:[#allocation11 + $0xb4] sm:$0xf]  ;;  %v3103_v3 = vld [vmem:[#allocation11 + $0x14] sm:$0xf0]  ;;  %v2892_v10 = vld [vmem:[#allocation11 + $0xa0] sm:$0xf] }
 0x19e   :  { %1767 = vmatpush.bf16.msrb.mxu3 %v2769_v17  ;;  %1755 = vmatpush.bf16.msrb.mxu2 %v2689_v25  ;;  %v2918_v25 = vld [vmem:[#allocation11 + $0xd8] sm:$0xf0] }
 0x19f   :  { %1739 = vmatpush.bf16.msrb.mxu1 %v2765_v15  ;;  %1937 = vmatpush.bf16.msra.mxu0 %v2861_v39  ;;  %v2846_v15 = vld [vmem:[#allocation11 + $0x48] sm:$0xf0]  ;;  %v2921_v29 = vor.u32 %v3126_v24, %v2918_v25  ;;  %v3125_v39 = vld [vmem:[#allocation11 + $0xc4] sm:$0xf0]  ;;  %v3100_v24 = vld [vmem:[#allocation11 + $0x4] sm:$0xf] }
 0x1a0   :  { %v2849_v19 = vor.u32 %v3108_v13, %v2846_v15  ;;  %v3121_v13 = vld [vmem:[#allocation11 + $0xa4] sm:$0xf0]  ;;  %v3120_v15 = vld [vmem:[#allocation11 + $0xa4] sm:$0xf]  ;;  %v2814_v25 = vld [vmem:[#allocation11 + $0x8] sm:$0xf0] }
 0x1a2   :  { %1964 = vmatpush.bf16.msra.mxu2 %v2873_v30  ;;  %1768 = vmatpush.bf16.msrb.mxu3 %v2761_v55  ;;  %v2836_v30 = vld [vmem:[#allocation11 + $0x30] sm:$0xf] }
 0x1a3   :  { %1740 = vmatpush.bf16.msrb.mxu1 %v2757_v35  ;;  %1938 = vmatpush.bf16.msra.mxu0 %v2853_v63  ;;  %v2837_v33 = vor.u32 %v3107_v31, %v2836_v30  ;;  %v2838_v35 = vld [vmem:[#allocation11 + $0x38] sm:$0xf0]  ;;  %v2884_v30 = vld [vmem:[#allocation11 + $0x90] sm:$0xf] }
 0x1a6   :  { %1965 = vmatpush.bf16.msra.mxu2 %v2865_v43  ;;  %1769 = vmatpush.bf16.msrb.mxu3 %v2753_v48  ;;  %v3105_v48 = vld [vmem:[#allocation11 + $0x24] sm:$0xf0] }
 0x1a7   :  { %1741 = vmatpush.bf16.msrb.mxu1 %v2749_v44  ;;  %1939 = vmatpush.bf16.msra.mxu0 %v2845_v18  ;;  %v2828_v44 = vld [vmem:[#allocation11 + $0x20] sm:$0xf] }
 0x1a8   :  { %v2812_v18 = vld [vmem:[#allocation11] sm:$0xf] }
 0x1aa   :  { %1978 = vmatpush.bf16.msra.mxu3 %v2937_v49  ;;  %1966 = vmatpush.bf16.msra.mxu2 %v2857_v2  ;;  %v2900_v49 = vld [vmem:[#allocation11 + $0xb0] sm:$0xf] }
 0x1ab   :  { %1950 = vmatpush.bf16.msra.mxu1 %v2933_v57  ;;  %1940 = vmatpush.bf16.msra.mxu0 %v2837_v33  ;;  %v2833_v57 = vor.u32 %v3104_v50, %v2830_v52  ;;  %v2901_v0 = vor.u32 %v3123_v59, %v2900_v49  ;;  %v2820_v2 = vld [vmem:[#allocation11 + $0x10] sm:$0xf]  ;;  %v3118_v33 = vld [vmem:[#allocation11 + $0x94] sm:$0xf] }
 0x1ae   :  { %1979 = vmatpush.bf16.msra.mxu3 %v2929_v9  ;;  %1967 = vmatpush.bf16.msra.mxu2 %v2849_v19  ;;  %v2821_v9 = vor.u32 %v3103_v3, %v2820_v2  ;;  %v3101_v19 = vld [vmem:[#allocation11 + $0x4] sm:$0xf0] }
 0x1af   :  { %1951 = vmatpush.bf16.msra.mxu1 %v2925_v6  ;;  %v3102_v6 = vld [vmem:[#allocation11 + $0x14] sm:$0xf] }
 0x1b2   :  { %1980 = vmatpush.bf16.msra.mxu3 %v2921_v29  ;;  %v2817_v29 = vor.u32 %v3100_v24, %v2814_v25 }
 0x1b3   :  { %1952 = vmatpush.bf16.msra.mxu1 %v2917_v23  ;;  %v2813_v23 = vor.u32 %v3101_v19, %v2812_v18 }
 0x1b6   :  { %1981 = vmatpush.bf16.msra.mxu3 %v2913_v47 }
 0x206   :  { %v1385_v51 = vpop.f32.mrf.mxu0 }
 0x207   :  { %v1386_v54 = vadd.f32 %v1385_v51, %v1212_v34  ;;  %v3106_v51 = vld [vmem:[#allocation11 + $0x34] sm:$0xf] }
 0x208   :  { %v2841_v38 = vor.u32 %v3106_v51, %v2838_v35  ;;  %v2886_v51 = vld [vmem:[#allocation11 + $0x98] sm:$0xf0] }
 0x20a   :  { %1968 = vmatpush.bf16.msra.mxu2 %v2841_v38 }
 0x20c   :  { %v1413_v56 = vpop.f32.mrf.mxu2 }
 0x20d   :  { %v1414_v16 = vadd.f32 %v1413_v56, %v1213_v61  ;;  %v2829_v56 = vor.u32 %v3105_v48, %v2828_v44 }
 0x20e   :  { %v1387_v11 = vpop.f32.mrf.mxu0  ;;  %1969 = vmatpush.bf16.msra.mxu2 %v2833_v57 }
 0x20f   :  { %v1388_v26 = vadd.f32 %v1387_v11, %v1212_v34  ;;  %v2908_v34 = vld [vmem:[#allocation11 + $0xc0] sm:$0xf]  ;;  %1941 = vmatpush.bf16.msra.mxu0 %v2829_v56 }
 0x210   :  { %v2909_v46 = vor.u32 %v3125_v39, %v2908_v34  ;;  %v2889_v39 = vor.u32 %v3118_v33, %v2886_v51 }
 0x212   :  { %1953 = vmatpush.bf16.msra.mxu1 %v2909_v46 }
 0x213   :  { %1942 = vmatpush.bf16.msra.mxu0 %v2821_v9 }
 0x214   :  { %v1415_v55 = vpop.f32.mrf.mxu2 }
 0x215   :  { %v1416_v45 = vadd.f32 %v1415_v55, %v1213_v61  ;;  %v2876_v55 = vld [vmem:[#allocation11 + $0x80] sm:$0xf] }
 0x216   :  { %v1399_v62 = vpop.f32.mrf.mxu1  ;;  %1954 = vmatpush.bf16.msra.mxu1 %v2901_v0  ;;  %v2877_v44 = vor.u32 %v3117_v40, %v2876_v55 }
 0x217   :  { %v3533_v1 = vadd.f32 %v1399_v62, %v1386_v54  ;;  %v2902_v62 = vld [vmem:[#allocation11 + $0xb8] sm:$0xf0]  ;;  %1943 = vmatpush.bf16.msra.mxu0 %v2813_v23 }
 0x218   :  { %v2905_v5 = vor.u32 %v3122_v60, %v2902_v62 }
 0x219   :  { %v1436_v8 = vand.u32 2147483647, %v3533_v1  ;;  %v1432_v0 = vmax.f32 %v3533_v1, 0.0 }
 0x21a   :  { %1982 = vmatpush.bf16.msra.mxu3 %v2905_v5 }
 0x21b   :  { %v1440_v17 = vsub.f32 0.0, %v1436_v8  ;;  %v2822_v8 = vld [vmem:[#allocation11 + $0x18] sm:$0xf0] }
 0x21c   :  { %v1427_v22 = vpop.f32.mrf.mxu3  ;;  %v2825_v12 = vor.u32 %v3102_v6, %v2822_v8 }
 0x21d   :  { %v1444_v27 = vmul.f32 1.442695, %v1440_v17  ;;  %v3540_v28 = vadd.f32 %v1427_v22, %v1414_v16  ;;  %v2893_v16 = vor.u32 %v3121_v13, %v2892_v10  ;;  %v2894_v17 = vld [vmem:[#allocation11 + $0xa8] sm:$0xf0] }
 0x21e   :  { %v1401_v32 = vpop.f32.mrf.mxu1  ;;  %1970 = vmatpush.bf16.msra.mxu2 %v2825_v12  ;;  %v2897_v22 = vor.u32 %v3120_v15, %v2894_v17 }
 0x21f   :  { %3176 = vpow2.f32 %v1444_v27  ;;  %v1437_v36 = vand.u32 2147483647, %v3540_v28  ;;  %v3543_v37 = vadd.f32 %v1401_v32, %v1388_v26  ;;  %1955 = vmatpush.bf16.msra.mxu1 %v2893_v16  ;;  %v3119_v32 = vld [vmem:[#allocation11 + $0x94] sm:$0xf0]  ;;  %v1433_v16 = vmax.f32 %v3540_v28, 0.0 }
 0x220   :  { %1983 = vmatpush.bf16.msra.mxu3 %v2897_v22  ;;  %v2885_v34 = vor.u32 %v3119_v32, %v2884_v30 }
 0x221   :  { %v1441_v42 = vsub.f32 0.0, %v1437_v36  ;;  %v1438_v43 = vand.u32 2147483647, %v3543_v37  ;;  %v1434_v3 = vmax.f32 %v3543_v37, 0.0 }
 0x222   :  { %1971 = vmatpush.bf16.msra.mxu2 %v2817_v29 }
 0x223   :  { %v1446_v53 = vmul.f32 1.442695, %v1441_v42  ;;  %v1442_v54 = vsub.f32 0.0, %v1438_v43  ;;  %v2878_v42 = vld [vmem:[#allocation11 + $0x88] sm:$0xf0]  ;;  %1956 = vmatpush.bf16.msra.mxu1 %v2885_v34 }
 0x224   :  { %v1429_v58 = vpop.f32.mrf.mxu3  ;;  %1984 = vmatpush.bf16.msra.mxu3 %v2889_v39  ;;  %v2881_v46 = vor.u32 %v3116_v41, %v2878_v42 }
 0x225   :  { %v3548_v63 = vpop.eup %3176  ;;  %3178 = vpow2.f32 %v1446_v53  ;;  %v1448_v14 = vmul.f32 1.442695, %v1442_v54  ;;  %v3550_v61 = vadd.f32 %v1429_v58, %v1416_v45 }
 0x226   :  { %v1452_v4 = vadd.f32 1.0, %v3548_v63  ;;  %v1455_v26 = vmul.f32 -0.5, %v3548_v63  ;;  %v1458_v45 = vand.u32 2147483647, %v3548_v63 }
 0x227   :  { %3180 = vpow2.f32 %v1448_v14  ;;  %v1439_v7 = vand.u32 2147483647, %v3550_v61  ;;  %1957 = vmatpush.bf16.msra.mxu1 %v2877_v44  ;;  %v1435_v17 = vmax.f32 %v3550_v61, 0.0  ;;  %v1493_v23 = vpack.c.bf16 %v3550_v61, %v3540_v28 }
 0x228   :  { %3182 = vlog2.f32 %v1452_v4  ;;  %v1456_v43 = vadd.f32 1.0, %v1455_v26  ;;  %vm1459_vm0 = vcmp.lt.f32.partialorder %v1458_v45, 0.0004427343  ;;  %1985 = vmatpush.bf16.msra.mxu3 %v2881_v46 }
 0x229   :  { %v1443_v11 = vsub.f32 0.0, %v1439_v7 }
 0x22a   :  { %v1457_v57 = vmul.f32 %v3548_v63, %v1456_v43 }
 0x22b   :  { %v3554_v20 = vpop.eup %3178  ;;  %v1450_v21 = vmul.f32 1.442695, %v1443_v11 }
 0x22c   :  { %v1461_v27 = vadd.f32 1.0, %v3554_v20  ;;  %v1464_v50 = vmul.f32 -0.5, %v3554_v20  ;;  %v1467_v2 = vand.u32 2147483647, %v3554_v20 }
 0x22d   :  { %v3181_v31 = vpop.eup %3180  ;;  %3184 = vpow2.f32 %v1450_v21 }
 0x22e   :  { %v1470_v35 = vadd.f32 1.0, %v3181_v31  ;;  %3186 = vlog2.f32 %v1461_v27  ;;  %v1473_v36 = vmul.f32 -0.5, %v3181_v31  ;;  %v3183_v38 = vpop.eup %3182  ;;  %v1476_v53 = vand.u32 2147483647, %v3181_v31 }
 0x22f   :  { %v1454_v48 = vmul.f32 0.6931472, %v3183_v38  ;;  %v1465_v60 = vadd.f32 1.0, %v1464_v50  ;;  %vm1468_vm2 = vcmp.lt.f32.partialorder %v1467_v2, 0.0004427343 }
 0x230   :  { %3188 = vlog2.f32 %v1470_v35  ;;  %v1474_v52 = vadd.f32 1.0, %v1473_v36  ;;  %vm1477_vm1 = vcmp.lt.f32.partialorder %v1476_v53, 0.0004427343 }
 0x231   :  { %v1460_v59 = vsel %vm1459_vm0, %v1457_v57, %v1454_v48  ;;  %v1466_v9 = vmul.f32 %v3554_v20, %v1465_v60  ;;  %v1492_v20 = vpack.c.bf16 %v3543_v37, %v3533_v1 }
 0x232   :  { %v1475_v14 = vmul.f32 %v3181_v31, %v1474_v52  ;;  %v1488_v6 = vadd.f32 %v1460_v59, %v1432_v0 }
 0x233   :  { %v3185_v47 = vpop.eup %3184 }
 0x234   :  { %v1479_v54 = vadd.f32 1.0, %v3185_v47  ;;  %v3187_v56 = vpop.eup %3186  ;;  %v1482_v49 = vmul.f32 -0.5, %v3185_v47  ;;  %v1485_v8 = vand.u32 2147483647, %v3185_v47 }
 0x235   :  { %v1463_v4 = vmul.f32 0.6931472, %v3187_v56 }
 0x236   :  { %v3189_v58 = vpop.eup %3188  ;;  %3190 = vlog2.f32 %v1479_v54  ;;  %v1483_v63 = vadd.f32 1.0, %v1482_v49  ;;  %vm1486_vm3 = vcmp.lt.f32.partialorder %v1485_v8, 0.0004427343 }
 0x237   :  { %v1472_v62 = vmul.f32 0.6931472, %v3189_v58  ;;  %v1469_v12 = vsel %vm1468_vm2, %v1466_v9, %v1463_v4 }
 0x238   :  { %v1484_v15 = vmul.f32 %v3185_v47, %v1483_v63  ;;  %v1489_v19 = vadd.f32 %v1469_v12, %v1433_v16 }
 0x239   :  { %v1478_v5 = vsel %vm1477_vm1, %v1475_v14, %v1472_v62 }
 0x23a   :  { %v1490_v7 = vadd.f32 %v1478_v5, %v1434_v3 }
 0x23c   :  { %v3191_v10 = vpop.eup %3190  ;;  %v1526_v11 = vpack.c.bf16 %v1490_v7, %v1488_v6 }
 0x23d   :  { %v1481_v13 = vmul.f32 0.6931472, %v3191_v10 }
 0x23e   :  { %1728 = vmatmul.bf16.vlgmr.msrb.gmra.mxu0 %v1526_v11  ;;  %1756 = vmatmul.bf16.vlgmr.msrb.gmra.mxu2 %v1526_v11 }
 0x23f   :  { %v1487_v18 = vsel %vm1486_vm3, %v1484_v15, %v1481_v13 }
 0x240   :  { %v1491_v21 = vadd.f32 %v1487_v18, %v1435_v17 }
 0x242   :  { %v1527_v22 = vpack.c.bf16 %v1491_v21, %v1489_v19 }
 0x244   :  { %1742 = vmatmul.bf16.vlgmr.msrb.gmra.mxu1 %v1527_v22  ;;  %1770 = vmatmul.bf16.vlgmr.msrb.gmra.mxu3 %v1527_v22 }
 0x24e   :  { %1944 = vmatmul.bf16.vlgmr.msra.gmra.mxu0 %v1492_v20  ;;  %1972 = vmatmul.bf16.vlgmr.msra.gmra.mxu2 %v1492_v20 }
 0x254   :  { %1958 = vmatmul.bf16.vlgmr.msra.gmra.mxu1 %v1493_v23  ;;  %1986 = vmatmul.bf16.vlgmr.msra.gmra.mxu3 %v1493_v23 }
 0x2bb   :  { %v1729_v24 = vpop.f32.mrf.mxu0 }
 0x2c1   :  { %v1743_v25 = vpop.f32.mrf.mxu1  ;;  %v1757_v26 = vpop.f32.mrf.mxu2 }
 0x2c2   :  { %v1744_v33 = vadd.f32 %v1743_v25, %v1729_v24 }
 0x2c3   :  { %v1731_v27 = vpop.f32.mrf.mxu0 }
 0x2c7   :  { %v1771_v29 = vpop.f32.mrf.mxu3 }
 0x2c8   :  { %v1772_v36 = vadd.f32 %v1771_v29, %v1757_v26 }
 0x2c9   :  { %v1745_v30 = vpop.f32.mrf.mxu1  ;;  %v1759_v31 = vpop.f32.mrf.mxu2 }
 0x2ca   :  { %v1746_v28 = vadd.f32 %v1745_v30, %v1731_v27 }
 0x2cb   :  { %v1945_v32 = vpop.f32.mrf.mxu0 }
 0x2cc   :  { %v1946_v35 = vadd.f32 %v1945_v32, %v1744_v33 }
 0x2cf   :  { %v1773_v51 = vpop.f32.mrf.mxu3 }
 0x2d0   :  { %v1774_v47 = vadd.f32 %v1773_v51, %v1759_v31 }
 0x2d1   :  { %v1959_v55 = vpop.f32.mrf.mxu1  ;;  %v1973_v1 = vpop.f32.mrf.mxu2 }
 0x2d2   :  { %v1960_v37 = vadd.f32 %v1959_v55, %v1946_v35  ;;  %v1974_v61 = vadd.f32 %v1973_v1, %v1772_v36 }
 0x2d3   :  { %v1947_v38 = vpop.f32.mrf.mxu0 }
 0x2d4   :  { %v1992_v34 = vmul.f32 0.5, %v1960_v37  ;;  %v1948_v40 = vadd.f32 %v1947_v38, %v1746_v28 }
 0x2d6   :  { %3192 = vtanh.f32 %v1992_v34 }
 0x2d7   :  { %v1987_v39 = vpop.f32.mrf.mxu3 }
 0x2d8   :  { %v1988_v41 = vadd.f32 %v1987_v39, %v1974_v61 }
 0x2d9   :  { %v1961_v42 = vpop.f32.mrf.mxu1  ;;  %v1975_v45 = vpop.f32.mrf.mxu2 }
 0x2da   :  { %v1993_v43 = vmul.f32 0.5, %v1988_v41  ;;  %v1962_v44 = vadd.f32 %v1961_v42, %v1948_v40  ;;  %v1976_v52 = vadd.f32 %v1975_v45, %v1774_v47 }
 0x2dc   :  { %v3193_v46 = vpop.eup %3192  ;;  %3194 = vtanh.f32 %v1993_v43  ;;  %v1994_v48 = vmul.f32 0.5, %v1962_v44 }
 0x2dd   :  { %v2000_v50 = vmul.f32 0.5, %v3193_v46 }
 0x2de   :  { %3196 = vtanh.f32 %v1994_v48 }
 0x2df   :  { %v2004_v53 = vadd.f32 0.5, %v2000_v50  ;;  %v1989_v54 = vpop.f32.mrf.mxu3 }
 0x2e0   :  { %v1990_v56 = vadd.f32 %v1989_v54, %v1976_v52 }
 0x2e1   :  { %2008 = vst [vmem:[#allocation14] sm:$0xff] %v2004_v53 }
 0x2e2   :  { %v3195_v57 = vpop.eup %3194  ;;  %v1995_v49 = vmul.f32 0.5, %v1990_v56 }
 0x2e3   :  { %v2001_v58 = vmul.f32 0.5, %v3195_v57 }
 0x2e4   :  { %v3197_v59 = vpop.eup %3196  ;;  %3198 = vtanh.f32 %v1995_v49 }
 0x2e5   :  { %v2005_v60 = vadd.f32 0.5, %v2001_v58  ;;  %v2002_v62 = vmul.f32 0.5, %v3197_v59 }
 0x2e7   :  { %2009 = vst [vmem:[#allocation14 + $0x8] sm:$0xff] %v2005_v60  ;;  %v2006_v14 = vadd.f32 0.5, %v2002_v62 }
 0x2e9   :  { %2010 = vst [vmem:[#allocation14 + $0x10] sm:$0xff] %v2006_v14 }
 0x2ea   :  { %v3199_v0 = vpop.eup %3198 }
 0x2eb   :  { %v2003_v2 = vmul.f32 0.5, %v3199_v0 }
 0x2ed   :  { %v2007_v3 = vadd.f32 0.5, %v2003_v2 }
 0x2ef   :  { %2011 = vst [vmem:[#allocation14 + $0x18] sm:$0xff] %v2007_v3 }
 0x2f0   :  { %2024 = dma.vmem_to_hbm [thread:$0]  %s2017_s24, 512, %s2019_s27, [#allocation4], %s3403_s14, %s3403_s14, %s3404_s15  }
 0x2f1   :  { %3400 = dma.done.wait [#allocation4], 512  }
 0x2f2   :  { %3401 = vsyncadd [#allocation4], 4294966784 }
 0x2f3   :  { %2029 = vsyncpa [#allocation3], 1 }
 0x2f4   :  { %2030 = vsyncpa [#allocation6], 1 }
 0x2f5   :  { %2031 = vsyncpa [#allocation9], 1 }
 0x2f6   :  { %2032 = vsyncpa [#allocation12], 1 }
 0x2f7   :  { %2033 = vsyncpa [#allocation4], 1 }

</bundles_post_ra>
